<compile_context>
chip_gen: v7x
topology: tpu7x:2x2x1
jax: 0.10.0
libtpu: 0.0.40
codegen_flags: <defaults>
</compile_context>

<pallas_src>
import functools

import jax
import jax.numpy as jnp
import numpy as np
from jax import lax
from jax.experimental import pallas as pl
from jax.experimental.pallas import tpu as pltpu


def _graphsage_kernel(gather_idx_ref,                        # scalar prefetch (SMEM): (Bp*(S+1),) i32
                      feat_hbm, neigh_w_ref, w_self_ref, w_neigh_ref,   # inputs
                      out_ref,                               # output (TB, Ep) f32
                      gbuf, sems,                            # scratch: (2, TB, F) f32, DMA sems (2,)
                      *, tb, s, f, b_total):
    bt = pl.program_id(0)
    base = bt * tb
    nslabs = s + 1
    # Real (non-padded) batch rows in this tile; padded rows issue no DMAs.
    nrows = jnp.minimum(tb, b_total - base)

    def issue_slab(slab, slot):
        # One row DMA per real batch row for feature slab `slab`
        # (slab 0 = self node, slab j >= 1 = (j-1)-th sampled neighbor).
        def body(i, carry):
            row = base + i
            src = gather_idx_ref[row * nslabs + slab]
            pltpu.make_async_copy(feat_hbm.at[src], gbuf.at[slot, i],
                                  sems.at[slot]).start()
            return carry
        lax.fori_loop(0, nrows, body, 0)

    def wait_slab(slot):
        # Shared semaphore per slot; each wait decrements by one row-copy's amount.
        def body(i, carry):
            pltpu.make_async_copy(feat_hbm.at[0], gbuf.at[slot, i],
                                  sems.at[slot]).wait()
            return carry
        lax.fori_loop(0, nrows, body, 0)

    issue_slab(0, 0)                                   # prime: self-feature slab
    w = neigh_w_ref[...]                               # (tb, s) 1/deg weights, 0 => padded slot
    neigh_acc = jnp.zeros((tb, f), jnp.float32)
    acc = None
    for j in range(nslabs):                            # slab pipeline, S+1 static stages
        slot = j & 1
        if j + 1 < nslabs:
            issue_slab(j + 1, 1 - slot)                # overlap next slab's DMA with this slab
        wait_slab(slot)
        slab = gbuf[slot]                              # (tb, f) f32, contiguous slab
        if j == 0:
            # First half of the fused encoder matmul: self features.
            acc = jnp.dot(slab.astype(w_self_ref.dtype), w_self_ref[...],
                          preferred_element_type=jnp.float32)
        else:
            # Weighted-mean accumulation stays in f32 (v5e-friendly VALU path).
            neigh_acc = neigh_acc + slab * w[:, j - 1:j]
    # Second half of the encoder matmul: mean-aggregated neighbor features.
    acc = acc + jnp.dot(neigh_acc.astype(w_neigh_ref.dtype), w_neigh_ref[...],
                        preferred_element_type=jnp.float32)
    out_ref[...] = jnp.maximum(acc, 0.0)               # == relu(W @ combined.T).T


def graphsage_forward(node_idx, neigh_idx, neigh_w, feat_data, W,
                      *, batch_tile=128, lane=128):
    """node_idx: (B,) int; neigh_idx: (B,S) int; neigh_w: (B,S) f32 (0 => padded slot);
    feat_data: (N,F) f32; W: (E, 2F) encoder weight (self-half first). Returns (B,E) f32."""
    B, S = neigh_idx.shape
    N, F = feat_data.shape
    E = W.shape[0]
    assert W.shape == (E, 2 * F)

    Bp = pl.cdiv(B, batch_tile) * batch_tile          # pad batch to the tile size
    Ep = pl.cdiv(E, lane) * lane                      # pad embed dim to a lane-dense output

    # Fused gather-index table: column 0 = self node id, columns 1..S = sampled neighbors.
    gather_idx = jnp.zeros((Bp, S + 1), jnp.int32)
    gather_idx = gather_idx.at[:B, 0].set(node_idx.astype(jnp.int32))
    gather_idx = gather_idx.at[:B, 1:].set(neigh_idx.astype(jnp.int32))
    gather_idx = gather_idx.reshape(-1)

    neigh_w_p = jnp.zeros((Bp, S), jnp.float32).at[:B].set(neigh_w.astype(jnp.float32))

    # Split encoder weight: first F columns act on self_feats, last F on neigh_feats
    # (matches torch.cat([self, neigh], dim=1)).  Transposed, E padded to Ep, bf16.
    w_self = jnp.zeros((F, Ep), jnp.bfloat16).at[:, :E].set(W[:, :F].T.astype(jnp.bfloat16))
    w_neigh = jnp.zeros((F, Ep), jnp.bfloat16).at[:, :E].set(W[:, F:].T.astype(jnp.bfloat16))

    kernel = functools.partial(_graphsage_kernel, tb=batch_tile, s=S, f=F, b_total=B)
    out = pl.pallas_call(
        kernel,
        out_shape=jax.ShapeDtypeStruct((Bp, Ep), jnp.float32),
        grid_spec=pltpu.PrefetchScalarGridSpec(
            num_scalar_prefetch=1,                    # gather_idx -> SMEM
            grid=(Bp // batch_tile,),
            in_specs=[
                pl.BlockSpec(memory_space=pl.ANY),                           # feat_data stays in HBM
                pl.BlockSpec((batch_tile, S), lambda bt, gi: (bt, 0)),       # per-tile neighbor weights
                pl.BlockSpec((F, Ep), lambda bt, gi: (0, 0)),                # resident self-half weights
                pl.BlockSpec((F, Ep), lambda bt, gi: (0, 0)),                # resident neigh-half weights
            ],
            out_specs=pl.BlockSpec((batch_tile, Ep), lambda bt, gi: (bt, 0)),
            scratch_shapes=[
                pltpu.VMEM((2, batch_tile, F), jnp.float32),                 # double-buffered gather slabs
                pltpu.SemaphoreType.DMA((2,)),                               # one DMA sem per slot
            ]),
        compiler_params=pltpu.CompilerParams(
            dimension_semantics=("parallel",)),       # batch tiles split across TCs (v7x)
    )(gather_idx, feat_data.astype(jnp.float32), neigh_w_p, w_self, w_neigh)
    return out[:B, :E]


def build_batch_indices(nodes, adj_list, num_samples):
    """Glue replacing MeanAggregator's neighbor sampling with index/weight arrays.
    TODO(synk): the module uses random.sample; we deterministically take the first
    num_samples neighbors so the run is reproducible."""
    B = len(nodes)
    node_idx = np.zeros((B,), np.int32)
    neigh_idx = np.zeros((B, num_samples), np.int32)
    neigh_w = np.zeros((B, num_samples), np.float32)
    for i, n in enumerate(nodes):
        node_idx[i] = n
        neighs = sorted(adj_list[n])[:num_samples]
        if neighs:
            w = 1.0 / len(neighs)
            for j, nb in enumerate(neighs):
                neigh_idx[i, j] = nb
                neigh_w[i, j] = w
        # nodes with zero neighbors get neigh_feats == 0 (PyTorch module would divide by zero)
    return jnp.asarray(node_idx), jnp.asarray(neigh_idx), jnp.asarray(neigh_w)


if __name__ == "__main__":
    # Small deterministic problem (batch pads 200 -> 256, a 2-tile grid).
    num_nodes = 512    # graph size N
    feat_dim = 128     # F
    embed_dim = 16     # E
    batch = 200        # len(nodes)
    num_samples = 5    # S

    key = jax.random.PRNGKey(0)
    k_feat, k_w = jax.random.split(key)

    feat_data = jax.random.normal(k_feat, (num_nodes, feat_dim), jnp.float32)

    # Deterministic synthetic adjacency list (ring + a few long-range edges).
    adj_list = {n: {(n + 1) % num_nodes, (n - 1) % num_nodes,
                    (n + 7) % num_nodes, (n + 13) % num_nodes}
                for n in range(num_nodes)}

    # Encoder weight W: (E, 2F), xavier-uniform style init.  First F columns act on
    # self_feats, last F on neigh_feats (matches torch.cat([self, neigh], dim=1)).
    limit = (6.0 / (embed_dim + 2 * feat_dim)) ** 0.5
    W = jax.random.uniform(k_w, (embed_dim, 2 * feat_dim), jnp.float32,
                           minval=-limit, maxval=limit)

    nodes = list(range(0, 2 * batch, 2))  # 200 distinct node ids < num_nodes
    node_idx, neigh_idx, neigh_w = build_batch_indices(nodes, adj_list, num_samples)

    out = graphsage_forward(node_idx, neigh_idx, neigh_w, feat_data, W)
    out = jax.block_until_ready(out)

    # Pure-JAX references of the same semantics.
    self_feats = feat_data[node_idx]                                        # (B, F)
    neigh_feats = (neigh_w[:, :, None] * feat_data[neigh_idx]).sum(axis=1)  # (B, F)
    combined = jnp.concatenate([self_feats, neigh_feats], axis=1)
    ref_f32 = jnp.maximum(combined @ W.T, 0.0)                              # == relu(W @ combined.T).T
    ref_bf16 = jnp.maximum(
        jnp.dot(self_feats.astype(jnp.bfloat16), W[:, :feat_dim].T.astype(jnp.bfloat16),
                preferred_element_type=jnp.float32)
        + jnp.dot(neigh_feats.astype(jnp.bfloat16), W[:, feat_dim:].T.astype(jnp.bfloat16),
                  preferred_element_type=jnp.float32), 0.0)

    assert out.shape == (batch, embed_dim)
    # Tight check against a reference that mirrors the kernel's bf16 MXU path.
    assert jnp.allclose(out, ref_bf16, atol=5e-3, rtol=5e-3), \
        float(jnp.max(jnp.abs(out - ref_bf16)))
    # Loose check against the pure-f32 module semantics (bf16 rounding slack).
    assert jnp.allclose(out, ref_f32, atol=7e-2, rtol=5e-2), \
        float(jnp.max(jnp.abs(out - ref_f32)))

    # TODO(synk): the module's loss() (per-node sigmoid similarities with Python-side
    # random negative sampling) is not part of forward() and is left out.
    print("KERNEL_OK")
</pallas_src>

<mosaic_0001>
module attributes {stable_mosaic.version = 11 : i64} {
  func.func @_graphsage_kernel(%arg0: i32, %arg1: memref<1536xi32, #tpu.memory_space<smem>>, %arg2: memref<512x128xf32, #tpu.memory_space<any>>, %arg3: memref<128x5xf32, #tpu.memory_space<vmem>>, %arg4: memref<128x128xbf16, #tpu.memory_space<vmem>>, %arg5: memref<128x128xbf16, #tpu.memory_space<vmem>>, %arg6: memref<128x128xf32, #tpu.memory_space<vmem>>, %arg7: memref<2x128x128xf32, #tpu.memory_space<vmem>>, %arg8: memref<2x!tpu.dma_semaphore, #tpu.memory_space<semaphore_mem>>) attributes {dimension_semantics = [#tpu.dimension_semantics<parallel>], iteration_bounds = array<i64: 2>, scalar_prefetch = 1 : i64, scratch_operands = 2 : i64, tpu.core_type = #tpu.core_type<tc>, window_params = [{}, {transform_indices = @transform_1, window_bounds = array<i64: 128, 5>}, {pipeline_mode = #tpu.pipeline_mode<synchronous>, transform_indices = @transform_2, window_bounds = array<i64: 128, 128>}, {pipeline_mode = #tpu.pipeline_mode<synchronous>, transform_indices = @transform_3, window_bounds = array<i64: 128, 128>}, {transform_indices = @transform_4, window_bounds = array<i64: 128, 128>}]} {
    %c128_i32 = arith.constant 128 : i32
    %0 = arith.muli %arg0, %c128_i32 : i32
    %c200_i32 = arith.constant 200 : i32
    %1 = arith.subi %c200_i32, %0 : i32
    %c128_i32_0 = arith.constant 128 : i32
    %2 = arith.minsi %c128_i32_0, %1 : i32
    %c0_i32 = arith.constant 0 : i32
    %c0_i32_1 = arith.constant 0 : i32
    %3 = arith.subi %2, %c0_i32_1 : i32
    %4 = arith.addi %c0_i32_1, %3 : i32
    %c1_i32 = arith.constant 1 : i32
    scf.for %arg9 = %c0_i32_1 to %4 step %c1_i32  : i32 {
      %71 = arith.addi %0, %arg9 : i32
      %c6_i32 = arith.constant 6 : i32
      %72 = arith.muli %71, %c6_i32 : i32
      %c0_i32_62 = arith.constant 0 : i32
      %73 = arith.addi %72, %c0_i32_62 : i32
      %74 = arith.index_cast %73 : i32 to index
      %75 = memref.load %arg1[%74] : memref<1536xi32, #tpu.memory_space<smem>>
      %c0_i32_63 = arith.constant 0 : i32
      %c0_i32_64 = arith.constant 0 : i32
      %c0_i32_65 = arith.constant 0 : i32
      %76 = tpu.memref_slice %arg2[%75, %c0_i32_65] : memref<512x128xf32, #tpu.memory_space<any>> -> memref<1x128xf32, #tpu.memory_space<any>>
      %77 = tpu.memref_squeeze %76 : memref<1x128xf32, #tpu.memory_space<any>> -> memref<128xf32, #tpu.memory_space<any>>
      %c0_i32_66 = arith.constant 0 : i32
      %78 = tpu.memref_slice %arg7[%c0_i32_63, %arg9, %c0_i32_66] : memref<2x128x128xf32, #tpu.memory_space<vmem>> -> memref<1x1x128xf32, #tpu.memory_space<vmem>>
      %79 = tpu.memref_squeeze %78 : memref<1x1x128xf32, #tpu.memory_space<vmem>> -> memref<128xf32, #tpu.memory_space<vmem>>
      %80 = tpu.memref_slice %arg8[%c0_i32_64] : memref<2x!tpu.dma_semaphore, #tpu.memory_space<semaphore_mem>> -> memref<1x!tpu.dma_semaphore, #tpu.memory_space<semaphore_mem>>
      %81 = tpu.memref_squeeze %80 : memref<1x!tpu.dma_semaphore, #tpu.memory_space<semaphore_mem>> -> memref<!tpu.dma_semaphore, #tpu.memory_space<semaphore_mem>>
      tpu.enqueue_dma source(%77 : memref<128xf32, #tpu.memory_space<any>>) target(%79 : memref<128xf32, #tpu.memory_space<vmem>>) target_semaphore(%81 : memref<!tpu.dma_semaphore, #tpu.memory_space<semaphore_mem>>)
    }
    %c0 = arith.constant 0 : index
    %c0_2 = arith.constant 0 : index
    %5 = vector.load %arg3[%c0, %c0_2] : memref<128x5xf32, #tpu.memory_space<vmem>>, vector<128x5xf32>
    %cst = arith.constant 0.000000e+00 : f32
    %6 = vector.broadcast %cst : f32 to vector<128x128xf32>
    %c0_i32_3 = arith.constant 0 : i32
    %c0_i32_4 = arith.constant 0 : i32
    %7 = arith.subi %2, %c0_i32_4 : i32
    %8 = arith.addi %c0_i32_4, %7 : i32
    %c1_i32_5 = arith.constant 1 : i32
    scf.for %arg9 = %c0_i32_4 to %8 step %c1_i32_5  : i32 {
      %71 = arith.addi %0, %arg9 : i32
      %c6_i32 = arith.constant 6 : i32
      %72 = arith.muli %71, %c6_i32 : i32
      %c1_i32_62 = arith.constant 1 : i32
      %73 = arith.addi %72, %c1_i32_62 : i32
      %74 = arith.index_cast %73 : i32 to index
      %75 = memref.load %arg1[%74] : memref<1536xi32, #tpu.memory_space<smem>>
      %c1_i32_63 = arith.constant 1 : i32
      %c1_i32_64 = arith.constant 1 : i32
      %c0_i32_65 = arith.constant 0 : i32
      %76 = tpu.memref_slice %arg2[%75, %c0_i32_65] : memref<512x128xf32, #tpu.memory_space<any>> -> memref<1x128xf32, #tpu.memory_space<any>>
      %77 = tpu.memref_squeeze %76 : memref<1x128xf32, #tpu.memory_space<any>> -> memref<128xf32, #tpu.memory_space<any>>
      %c0_i32_66 = arith.constant 0 : i32
      %78 = tpu.memref_slice %arg7[%c1_i32_63, %arg9, %c0_i32_66] : memref<2x128x128xf32, #tpu.memory_space<vmem>> -> memref<1x1x128xf32, #tpu.memory_space<vmem>>
      %79 = tpu.memref_squeeze %78 : memref<1x1x128xf32, #tpu.memory_space<vmem>> -> memref<128xf32, #tpu.memory_space<vmem>>
      %80 = tpu.memref_slice %arg8[%c1_i32_64] : memref<2x!tpu.dma_semaphore, #tpu.memory_space<semaphore_mem>> -> memref<1x!tpu.dma_semaphore, #tpu.memory_space<semaphore_mem>>
      %81 = tpu.memref_squeeze %80 : memref<1x!tpu.dma_semaphore, #tpu.memory_space<semaphore_mem>> -> memref<!tpu.dma_semaphore, #tpu.memory_space<semaphore_mem>>
      tpu.enqueue_dma source(%77 : memref<128xf32, #tpu.memory_space<any>>) target(%79 : memref<128xf32, #tpu.memory_space<vmem>>) target_semaphore(%81 : memref<!tpu.dma_semaphore, #tpu.memory_space<semaphore_mem>>)
    }
    %c0_i32_6 = arith.constant 0 : i32
    %c0_i32_7 = arith.constant 0 : i32
    %9 = arith.subi %2, %c0_i32_7 : i32
    %10 = arith.addi %c0_i32_7, %9 : i32
    %c1_i32_8 = arith.constant 1 : i32
    scf.for %arg9 = %c0_i32_7 to %10 step %c1_i32_8  : i32 {
      %c0_i32_62 = arith.constant 0 : i32
      %c0_i32_63 = arith.constant 0 : i32
      %c0_i32_64 = arith.constant 0 : i32
      %c0_i32_65 = arith.constant 0 : i32
      %71 = tpu.memref_slice %arg2[%c0_i32_62, %c0_i32_65] : memref<512x128xf32, #tpu.memory_space<any>> -> memref<1x128xf32, #tpu.memory_space<any>>
      %72 = tpu.memref_squeeze %71 : memref<1x128xf32, #tpu.memory_space<any>> -> memref<128xf32, #tpu.memory_space<any>>
      %c0_i32_66 = arith.constant 0 : i32
      %73 = tpu.memref_slice %arg7[%c0_i32_63, %arg9, %c0_i32_66] : memref<2x128x128xf32, #tpu.memory_space<vmem>> -> memref<1x1x128xf32, #tpu.memory_space<vmem>>
      %74 = tpu.memref_squeeze %73 : memref<1x1x128xf32, #tpu.memory_space<vmem>> -> memref<128xf32, #tpu.memory_space<vmem>>
      %75 = tpu.memref_slice %arg8[%c0_i32_64] : memref<2x!tpu.dma_semaphore, #tpu.memory_space<semaphore_mem>> -> memref<1x!tpu.dma_semaphore, #tpu.memory_space<semaphore_mem>>
      %76 = tpu.memref_squeeze %75 : memref<1x!tpu.dma_semaphore, #tpu.memory_space<semaphore_mem>> -> memref<!tpu.dma_semaphore, #tpu.memory_space<semaphore_mem>>
      tpu.wait_dma2 semaphore(%76 : memref<!tpu.dma_semaphore, #tpu.memory_space<semaphore_mem>>) src(%72 : memref<128xf32, #tpu.memory_space<any>>) dst(%74 : memref<128xf32, #tpu.memory_space<vmem>>)
    }
    %c0_9 = arith.constant 0 : index
    %c0_10 = arith.constant 0 : index
    %c0_11 = arith.constant 0 : index
    %11 = vector.load %arg7[%c0_9, %c0_10, %c0_11] : memref<2x128x128xf32, #tpu.memory_space<vmem>>, vector<1x128x128xf32>
    %12 = vector.shape_cast %11 : vector<1x128x128xf32> to vector<128x128xf32>
    %13 = arith.truncf %12 : vector<128x128xf32> to vector<128x128xbf16>
    %c0_12 = arith.constant 0 : index
    %c0_13 = arith.constant 0 : index
    %14 = vector.load %arg4[%c0_12, %c0_13] : memref<128x128xbf16, #tpu.memory_space<vmem>>, vector<128x128xbf16>
    %cst_14 = arith.constant dense<0.000000e+00> : vector<128x128xf32>
    %15 = tpu.matmul %13, %14, %cst_14 {dimension_numbers = #tpu.dot_dimension_numbers<[1], [0], [0], [1], [0, 0, 1, 1], [], []>} : vector<128x128xbf16>, vector<128x128xbf16>, vector<128x128xf32> -> vector<128x128xf32>
    %c0_i32_15 = arith.constant 0 : i32
    %c0_i32_16 = arith.constant 0 : i32
    %16 = arith.subi %2, %c0_i32_16 : i32
    %17 = arith.addi %c0_i32_16, %16 : i32
    %c1_i32_17 = arith.constant 1 : i32
    scf.for %arg9 = %c0_i32_16 to %17 step %c1_i32_17  : i32 {
      %71 = arith.addi %0, %arg9 : i32
      %c6_i32 = arith.constant 6 : i32
      %72 = arith.muli %71, %c6_i32 : i32
      %c2_i32 = arith.constant 2 : i32
      %73 = arith.addi %72, %c2_i32 : i32
      %74 = arith.index_cast %73 : i32 to index
      %75 = memref.load %arg1[%74] : memref<1536xi32, #tpu.memory_space<smem>>
      %c0_i32_62 = arith.constant 0 : i32
      %c0_i32_63 = arith.constant 0 : i32
      %c0_i32_64 = arith.constant 0 : i32
      %76 = tpu.memref_slice %arg2[%75, %c0_i32_64] : memref<512x128xf32, #tpu.memory_space<any>> -> memref<1x128xf32, #tpu.memory_space<any>>
      %77 = tpu.memref_squeeze %76 : memref<1x128xf32, #tpu.memory_space<any>> -> memref<128xf32, #tpu.memory_space<any>>
      %c0_i32_65 = arith.constant 0 : i32
      %78 = tpu.memref_slice %arg7[%c0_i32_62, %arg9, %c0_i32_65] : memref<2x128x128xf32, #tpu.memory_space<vmem>> -> memref<1x1x128xf32, #tpu.memory_space<vmem>>
      %79 = tpu.memref_squeeze %78 : memref<1x1x128xf32, #tpu.memory_space<vmem>> -> memref<128xf32, #tpu.memory_space<vmem>>
      %80 = tpu.memref_slice %arg8[%c0_i32_63] : memref<2x!tpu.dma_semaphore, #tpu.memory_space<semaphore_mem>> -> memref<1x!tpu.dma_semaphore, #tpu.memory_space<semaphore_mem>>
      %81 = tpu.memref_squeeze %80 : memref<1x!tpu.dma_semaphore, #tpu.memory_space<semaphore_mem>> -> memref<!tpu.dma_semaphore, #tpu.memory_space<semaphore_mem>>
      tpu.enqueue_dma source(%77 : memref<128xf32, #tpu.memory_space<any>>) target(%79 : memref<128xf32, #tpu.memory_space<vmem>>) target_semaphore(%81 : memref<!tpu.dma_semaphore, #tpu.memory_space<semaphore_mem>>)
    }
    %c0_i32_18 = arith.constant 0 : i32
    %c0_i32_19 = arith.constant 0 : i32
    %18 = arith.subi %2, %c0_i32_19 : i32
    %19 = arith.addi %c0_i32_19, %18 : i32
    %c1_i32_20 = arith.constant 1 : i32
    scf.for %arg9 = %c0_i32_19 to %19 step %c1_i32_20  : i32 {
      %c0_i32_62 = arith.constant 0 : i32
      %c1_i32_63 = arith.constant 1 : i32
      %c1_i32_64 = arith.constant 1 : i32
      %c0_i32_65 = arith.constant 0 : i32
      %71 = tpu.memref_slice %arg2[%c0_i32_62, %c0_i32_65] : memref<512x128xf32, #tpu.memory_space<any>> -> memref<1x128xf32, #tpu.memory_space<any>>
      %72 = tpu.memref_squeeze %71 : memref<1x128xf32, #tpu.memory_space<any>> -> memref<128xf32, #tpu.memory_space<any>>
      %c0_i32_66 = arith.constant 0 : i32
      %73 = tpu.memref_slice %arg7[%c1_i32_63, %arg9, %c0_i32_66] : memref<2x128x128xf32, #tpu.memory_space<vmem>> -> memref<1x1x128xf32, #tpu.memory_space<vmem>>
      %74 = tpu.memref_squeeze %73 : memref<1x1x128xf32, #tpu.memory_space<vmem>> -> memref<128xf32, #tpu.memory_space<vmem>>
      %75 = tpu.memref_slice %arg8[%c1_i32_64] : memref<2x!tpu.dma_semaphore, #tpu.memory_space<semaphore_mem>> -> memref<1x!tpu.dma_semaphore, #tpu.memory_space<semaphore_mem>>
      %76 = tpu.memref_squeeze %75 : memref<1x!tpu.dma_semaphore, #tpu.memory_space<semaphore_mem>> -> memref<!tpu.dma_semaphore, #tpu.memory_space<semaphore_mem>>
      tpu.wait_dma2 semaphore(%76 : memref<!tpu.dma_semaphore, #tpu.memory_space<semaphore_mem>>) src(%72 : memref<128xf32, #tpu.memory_space<any>>) dst(%74 : memref<128xf32, #tpu.memory_space<vmem>>)
    }
    %c1 = arith.constant 1 : index
    %c0_21 = arith.constant 0 : index
    %c0_22 = arith.constant 0 : index
    %20 = vector.load %arg7[%c1, %c0_21, %c0_22] : memref<2x128x128xf32, #tpu.memory_space<vmem>>, vector<1x128x128xf32>
    %21 = vector.shape_cast %20 : vector<1x128x128xf32> to vector<128x128xf32>
    %22 = vector.extract_strided_slice %5 {offsets = [0, 0], sizes = [128, 1], strides = [1, 1]} : vector<128x5xf32> to vector<128x1xf32>
    %23 = vector.broadcast %22 : vector<128x1xf32> to vector<128x128xf32>
    %24 = arith.mulf %21, %23 : vector<128x128xf32>
    %25 = arith.addf %6, %24 : vector<128x128xf32>
    %c0_i32_23 = arith.constant 0 : i32
    %c0_i32_24 = arith.constant 0 : i32
    %26 = arith.subi %2, %c0_i32_24 : i32
    %27 = arith.addi %c0_i32_24, %26 : i32
    %c1_i32_25 = arith.constant 1 : i32
    scf.for %arg9 = %c0_i32_24 to %27 step %c1_i32_25  : i32 {
      %71 = arith.addi %0, %arg9 : i32
      %c6_i32 = arith.constant 6 : i32
      %72 = arith.muli %71, %c6_i32 : i32
      %c3_i32 = arith.constant 3 : i32
      %73 = arith.addi %72, %c3_i32 : i32
      %74 = arith.index_cast %73 : i32 to index
      %75 = memref.load %arg1[%74] : memref<1536xi32, #tpu.memory_space<smem>>
      %c1_i32_62 = arith.constant 1 : i32
      %c1_i32_63 = arith.constant 1 : i32
      %c0_i32_64 = arith.constant 0 : i32
      %76 = tpu.memref_slice %arg2[%75, %c0_i32_64] : memref<512x128xf32, #tpu.memory_space<any>> -> memref<1x128xf32, #tpu.memory_space<any>>
      %77 = tpu.memref_squeeze %76 : memref<1x128xf32, #tpu.memory_space<any>> -> memref<128xf32, #tpu.memory_space<any>>
      %c0_i32_65 = arith.constant 0 : i32
      %78 = tpu.memref_slice %arg7[%c1_i32_62, %arg9, %c0_i32_65] : memref<2x128x128xf32, #tpu.memory_space<vmem>> -> memref<1x1x128xf32, #tpu.memory_space<vmem>>
      %79 = tpu.memref_squeeze %78 : memref<1x1x128xf32, #tpu.memory_space<vmem>> -> memref<128xf32, #tpu.memory_space<vmem>>
      %80 = tpu.memref_slice %arg8[%c1_i32_63] : memref<2x!tpu.dma_semaphore, #tpu.memory_space<semaphore_mem>> -> memref<1x!tpu.dma_semaphore, #tpu.memory_space<semaphore_mem>>
      %81 = tpu.memref_squeeze %80 : memref<1x!tpu.dma_semaphore, #tpu.memory_space<semaphore_mem>> -> memref<!tpu.dma_semaphore, #tpu.memory_space<semaphore_mem>>
      tpu.enqueue_dma source(%77 : memref<128xf32, #tpu.memory_space<any>>) target(%79 : memref<128xf32, #tpu.memory_space<vmem>>) target_semaphore(%81 : memref<!tpu.dma_semaphore, #tpu.memory_space<semaphore_mem>>)
    }
    %c0_i32_26 = arith.constant 0 : i32
    %c0_i32_27 = arith.constant 0 : i32
    %28 = arith.subi %2, %c0_i32_27 : i32
    %29 = arith.addi %c0_i32_27, %28 : i32
    %c1_i32_28 = arith.constant 1 : i32
    scf.for %arg9 = %c0_i32_27 to %29 step %c1_i32_28  : i32 {
      %c0_i32_62 = arith.constant 0 : i32
      %c0_i32_63 = arith.constant 0 : i32
      %c0_i32_64 = arith.constant 0 : i32
      %c0_i32_65 = arith.constant 0 : i32
      %71 = tpu.memref_slice %arg2[%c0_i32_62, %c0_i32_65] : memref<512x128xf32, #tpu.memory_space<any>> -> memref<1x128xf32, #tpu.memory_space<any>>
      %72 = tpu.memref_squeeze %71 : memref<1x128xf32, #tpu.memory_space<any>> -> memref<128xf32, #tpu.memory_space<any>>
      %c0_i32_66 = arith.constant 0 : i32
      %73 = tpu.memref_slice %arg7[%c0_i32_63, %arg9, %c0_i32_66] : memref<2x128x128xf32, #tpu.memory_space<vmem>> -> memref<1x1x128xf32, #tpu.memory_space<vmem>>
      %74 = tpu.memref_squeeze %73 : memref<1x1x128xf32, #tpu.memory_space<vmem>> -> memref<128xf32, #tpu.memory_space<vmem>>
      %75 = tpu.memref_slice %arg8[%c0_i32_64] : memref<2x!tpu.dma_semaphore, #tpu.memory_space<semaphore_mem>> -> memref<1x!tpu.dma_semaphore, #tpu.memory_space<semaphore_mem>>
      %76 = tpu.memref_squeeze %75 : memref<1x!tpu.dma_semaphore, #tpu.memory_space<semaphore_mem>> -> memref<!tpu.dma_semaphore, #tpu.memory_space<semaphore_mem>>
      tpu.wait_dma2 semaphore(%76 : memref<!tpu.dma_semaphore, #tpu.memory_space<semaphore_mem>>) src(%72 : memref<128xf32, #tpu.memory_space<any>>) dst(%74 : memref<128xf32, #tpu.memory_space<vmem>>)
    }
    %c0_29 = arith.constant 0 : index
    %c0_30 = arith.constant 0 : index
    %c0_31 = arith.constant 0 : index
    %30 = vector.load %arg7[%c0_29, %c0_30, %c0_31] : memref<2x128x128xf32, #tpu.memory_space<vmem>>, vector<1x128x128xf32>
    %31 = vector.shape_cast %30 : vector<1x128x128xf32> to vector<128x128xf32>
    %32 = vector.extract_strided_slice %5 {offsets = [0, 1], sizes = [128, 1], strides = [1, 1]} : vector<128x5xf32> to vector<128x1xf32>
    %33 = vector.broadcast %32 : vector<128x1xf32> to vector<128x128xf32>
    %34 = arith.mulf %31, %33 : vector<128x128xf32>
    %35 = arith.addf %25, %34 : vector<128x128xf32>
    %c0_i32_32 = arith.constant 0 : i32
    %c0_i32_33 = arith.constant 0 : i32
    %36 = arith.subi %2, %c0_i32_33 : i32
    %37 = arith.addi %c0_i32_33, %36 : i32
    %c1_i32_34 = arith.constant 1 : i32
    scf.for %arg9 = %c0_i32_33 to %37 step %c1_i32_34  : i32 {
      %71 = arith.addi %0, %arg9 : i32
      %c6_i32 = arith.constant 6 : i32
      %72 = arith.muli %71, %c6_i32 : i32
      %c4_i32 = arith.constant 4 : i32
      %73 = arith.addi %72, %c4_i32 : i32
      %74 = arith.index_cast %73 : i32 to index
      %75 = memref.load %arg1[%74] : memref<1536xi32, #tpu.memory_space<smem>>
      %c0_i32_62 = arith.constant 0 : i32
      %c0_i32_63 = arith.constant 0 : i32
      %c0_i32_64 = arith.constant 0 : i32
      %76 = tpu.memref_slice %arg2[%75, %c0_i32_64] : memref<512x128xf32, #tpu.memory_space<any>> -> memref<1x128xf32, #tpu.memory_space<any>>
      %77 = tpu.memref_squeeze %76 : memref<1x128xf32, #tpu.memory_space<any>> -> memref<128xf32, #tpu.memory_space<any>>
      %c0_i32_65 = arith.constant 0 : i32
      %78 = tpu.memref_slice %arg7[%c0_i32_62, %arg9, %c0_i32_65] : memref<2x128x128xf32, #tpu.memory_space<vmem>> -> memref<1x1x128xf32, #tpu.memory_space<vmem>>
      %79 = tpu.memref_squeeze %78 : memref<1x1x128xf32, #tpu.memory_space<vmem>> -> memref<128xf32, #tpu.memory_space<vmem>>
      %80 = tpu.memref_slice %arg8[%c0_i32_63] : memref<2x!tpu.dma_semaphore, #tpu.memory_space<semaphore_mem>> -> memref<1x!tpu.dma_semaphore, #tpu.memory_space<semaphore_mem>>
      %81 = tpu.memref_squeeze %80 : memref<1x!tpu.dma_semaphore, #tpu.memory_space<semaphore_mem>> -> memref<!tpu.dma_semaphore, #tpu.memory_space<semaphore_mem>>
      tpu.enqueue_dma source(%77 : memref<128xf32, #tpu.memory_space<any>>) target(%79 : memref<128xf32, #tpu.memory_space<vmem>>) target_semaphore(%81 : memref<!tpu.dma_semaphore, #tpu.memory_space<semaphore_mem>>)
    }
    %c0_i32_35 = arith.constant 0 : i32
    %c0_i32_36 = arith.constant 0 : i32
    %38 = arith.subi %2, %c0_i32_36 : i32
    %39 = arith.addi %c0_i32_36, %38 : i32
    %c1_i32_37 = arith.constant 1 : i32
    scf.for %arg9 = %c0_i32_36 to %39 step %c1_i32_37  : i32 {
      %c0_i32_62 = arith.constant 0 : i32
      %c1_i32_63 = arith.constant 1 : i32
      %c1_i32_64 = arith.constant 1 : i32
      %c0_i32_65 = arith.constant 0 : i32
      %71 = tpu.memref_slice %arg2[%c0_i32_62, %c0_i32_65] : memref<512x128xf32, #tpu.memory_space<any>> -> memref<1x128xf32, #tpu.memory_space<any>>
      %72 = tpu.memref_squeeze %71 : memref<1x128xf32, #tpu.memory_space<any>> -> memref<128xf32, #tpu.memory_space<any>>
      %c0_i32_66 = arith.constant 0 : i32
      %73 = tpu.memref_slice %arg7[%c1_i32_63, %arg9, %c0_i32_66] : memref<2x128x128xf32, #tpu.memory_space<vmem>> -> memref<1x1x128xf32, #tpu.memory_space<vmem>>
      %74 = tpu.memref_squeeze %73 : memref<1x1x128xf32, #tpu.memory_space<vmem>> -> memref<128xf32, #tpu.memory_space<vmem>>
      %75 = tpu.memref_slice %arg8[%c1_i32_64] : memref<2x!tpu.dma_semaphore, #tpu.memory_space<semaphore_mem>> -> memref<1x!tpu.dma_semaphore, #tpu.memory_space<semaphore_mem>>
      %76 = tpu.memref_squeeze %75 : memref<1x!tpu.dma_semaphore, #tpu.memory_space<semaphore_mem>> -> memref<!tpu.dma_semaphore, #tpu.memory_space<semaphore_mem>>
      tpu.wait_dma2 semaphore(%76 : memref<!tpu.dma_semaphore, #tpu.memory_space<semaphore_mem>>) src(%72 : memref<128xf32, #tpu.memory_space<any>>) dst(%74 : memref<128xf32, #tpu.memory_space<vmem>>)
    }
    %c1_38 = arith.constant 1 : index
    %c0_39 = arith.constant 0 : index
    %c0_40 = arith.constant 0 : index
    %40 = vector.load %arg7[%c1_38, %c0_39, %c0_40] : memref<2x128x128xf32, #tpu.memory_space<vmem>>, vector<1x128x128xf32>
    %41 = vector.shape_cast %40 : vector<1x128x128xf32> to vector<128x128xf32>
    %42 = vector.extract_strided_slice %5 {offsets = [0, 2], sizes = [128, 1], strides = [1, 1]} : vector<128x5xf32> to vector<128x1xf32>
    %43 = vector.broadcast %42 : vector<128x1xf32> to vector<128x128xf32>
    %44 = arith.mulf %41, %43 : vector<128x128xf32>
    %45 = arith.addf %35, %44 : vector<128x128xf32>
    %c0_i32_41 = arith.constant 0 : i32
    %c0_i32_42 = arith.constant 0 : i32
    %46 = arith.subi %2, %c0_i32_42 : i32
    %47 = arith.addi %c0_i32_42, %46 : i32
    %c1_i32_43 = arith.constant 1 : i32
    scf.for %arg9 = %c0_i32_42 to %47 step %c1_i32_43  : i32 {
      %71 = arith.addi %0, %arg9 : i32
      %c6_i32 = arith.constant 6 : i32
      %72 = arith.muli %71, %c6_i32 : i32
      %c5_i32 = arith.constant 5 : i32
      %73 = arith.addi %72, %c5_i32 : i32
      %74 = arith.index_cast %73 : i32 to index
      %75 = memref.load %arg1[%74] : memref<1536xi32, #tpu.memory_space<smem>>
      %c1_i32_62 = arith.constant 1 : i32
      %c1_i32_63 = arith.constant 1 : i32
      %c0_i32_64 = arith.constant 0 : i32
      %76 = tpu.memref_slice %arg2[%75, %c0_i32_64] : memref<512x128xf32, #tpu.memory_space<any>> -> memref<1x128xf32, #tpu.memory_space<any>>
      %77 = tpu.memref_squeeze %76 : memref<1x128xf32, #tpu.memory_space<any>> -> memref<128xf32, #tpu.memory_space<any>>
      %c0_i32_65 = arith.constant 0 : i32
      %78 = tpu.memref_slice %arg7[%c1_i32_62, %arg9, %c0_i32_65] : memref<2x128x128xf32, #tpu.memory_space<vmem>> -> memref<1x1x128xf32, #tpu.memory_space<vmem>>
      %79 = tpu.memref_squeeze %78 : memref<1x1x128xf32, #tpu.memory_space<vmem>> -> memref<128xf32, #tpu.memory_space<vmem>>
      %80 = tpu.memref_slice %arg8[%c1_i32_63] : memref<2x!tpu.dma_semaphore, #tpu.memory_space<semaphore_mem>> -> memref<1x!tpu.dma_semaphore, #tpu.memory_space<semaphore_mem>>
      %81 = tpu.memref_squeeze %80 : memref<1x!tpu.dma_semaphore, #tpu.memory_space<semaphore_mem>> -> memref<!tpu.dma_semaphore, #tpu.memory_space<semaphore_mem>>
      tpu.enqueue_dma source(%77 : memref<128xf32, #tpu.memory_space<any>>) target(%79 : memref<128xf32, #tpu.memory_space<vmem>>) target_semaphore(%81 : memref<!tpu.dma_semaphore, #tpu.memory_space<semaphore_mem>>)
    }
    %c0_i32_44 = arith.constant 0 : i32
    %c0_i32_45 = arith.constant 0 : i32
    %48 = arith.subi %2, %c0_i32_45 : i32
    %49 = arith.addi %c0_i32_45, %48 : i32
    %c1_i32_46 = arith.constant 1 : i32
    scf.for %arg9 = %c0_i32_45 to %49 step %c1_i32_46  : i32 {
      %c0_i32_62 = arith.constant 0 : i32
      %c0_i32_63 = arith.constant 0 : i32
      %c0_i32_64 = arith.constant 0 : i32
      %c0_i32_65 = arith.constant 0 : i32
      %71 = tpu.memref_slice %arg2[%c0_i32_62, %c0_i32_65] : memref<512x128xf32, #tpu.memory_space<any>> -> memref<1x128xf32, #tpu.memory_space<any>>
      %72 = tpu.memref_squeeze %71 : memref<1x128xf32, #tpu.memory_space<any>> -> memref<128xf32, #tpu.memory_space<any>>
      %c0_i32_66 = arith.constant 0 : i32
      %73 = tpu.memref_slice %arg7[%c0_i32_63, %arg9, %c0_i32_66] : memref<2x128x128xf32, #tpu.memory_space<vmem>> -> memref<1x1x128xf32, #tpu.memory_space<vmem>>
      %74 = tpu.memref_squeeze %73 : memref<1x1x128xf32, #tpu.memory_space<vmem>> -> memref<128xf32, #tpu.memory_space<vmem>>
      %75 = tpu.memref_slice %arg8[%c0_i32_64] : memref<2x!tpu.dma_semaphore, #tpu.memory_space<semaphore_mem>> -> memref<1x!tpu.dma_semaphore, #tpu.memory_space<semaphore_mem>>
      %76 = tpu.memref_squeeze %75 : memref<1x!tpu.dma_semaphore, #tpu.memory_space<semaphore_mem>> -> memref<!tpu.dma_semaphore, #tpu.memory_space<semaphore_mem>>
      tpu.wait_dma2 semaphore(%76 : memref<!tpu.dma_semaphore, #tpu.memory_space<semaphore_mem>>) src(%72 : memref<128xf32, #tpu.memory_space<any>>) dst(%74 : memref<128xf32, #tpu.memory_space<vmem>>)
    }
    %c0_47 = arith.constant 0 : index
    %c0_48 = arith.constant 0 : index
    %c0_49 = arith.constant 0 : index
    %50 = vector.load %arg7[%c0_47, %c0_48, %c0_49] : memref<2x128x128xf32, #tpu.memory_space<vmem>>, vector<1x128x128xf32>
    %51 = vector.shape_cast %50 : vector<1x128x128xf32> to vector<128x128xf32>
    %52 = vector.extract_strided_slice %5 {offsets = [0, 3], sizes = [128, 1], strides = [1, 1]} : vector<128x5xf32> to vector<128x1xf32>
    %53 = vector.broadcast %52 : vector<128x1xf32> to vector<128x128xf32>
    %54 = arith.mulf %51, %53 : vector<128x128xf32>
    %55 = arith.addf %45, %54 : vector<128x128xf32>
    %c0_i32_50 = arith.constant 0 : i32
    %c0_i32_51 = arith.constant 0 : i32
    %56 = arith.subi %2, %c0_i32_51 : i32
    %57 = arith.addi %c0_i32_51, %56 : i32
    %c1_i32_52 = arith.constant 1 : i32
    scf.for %arg9 = %c0_i32_51 to %57 step %c1_i32_52  : i32 {
      %c0_i32_62 = arith.constant 0 : i32
      %c1_i32_63 = arith.constant 1 : i32
      %c1_i32_64 = arith.constant 1 : i32
      %c0_i32_65 = arith.constant 0 : i32
      %71 = tpu.memref_slice %arg2[%c0_i32_62, %c0_i32_65] : memref<512x128xf32, #tpu.memory_space<any>> -> memref<1x128xf32, #tpu.memory_space<any>>
      %72 = tpu.memref_squeeze %71 : memref<1x128xf32, #tpu.memory_space<any>> -> memref<128xf32, #tpu.memory_space<any>>
      %c0_i32_66 = arith.constant 0 : i32
      %73 = tpu.memref_slice %arg7[%c1_i32_63, %arg9, %c0_i32_66] : memref<2x128x128xf32, #tpu.memory_space<vmem>> -> memref<1x1x128xf32, #tpu.memory_space<vmem>>
      %74 = tpu.memref_squeeze %73 : memref<1x1x128xf32, #tpu.memory_space<vmem>> -> memref<128xf32, #tpu.memory_space<vmem>>
      %75 = tpu.memref_slice %arg8[%c1_i32_64] : memref<2x!tpu.dma_semaphore, #tpu.memory_space<semaphore_mem>> -> memref<1x!tpu.dma_semaphore, #tpu.memory_space<semaphore_mem>>
      %76 = tpu.memref_squeeze %75 : memref<1x!tpu.dma_semaphore, #tpu.memory_space<semaphore_mem>> -> memref<!tpu.dma_semaphore, #tpu.memory_space<semaphore_mem>>
      tpu.wait_dma2 semaphore(%76 : memref<!tpu.dma_semaphore, #tpu.memory_space<semaphore_mem>>) src(%72 : memref<128xf32, #tpu.memory_space<any>>) dst(%74 : memref<128xf32, #tpu.memory_space<vmem>>)
    }
    %c1_53 = arith.constant 1 : index
    %c0_54 = arith.constant 0 : index
    %c0_55 = arith.constant 0 : index
    %58 = vector.load %arg7[%c1_53, %c0_54, %c0_55] : memref<2x128x128xf32, #tpu.memory_space<vmem>>, vector<1x128x128xf32>
    %59 = vector.shape_cast %58 : vector<1x128x128xf32> to vector<128x128xf32>
    %60 = vector.extract_strided_slice %5 {offsets = [0, 4], sizes = [128, 1], strides = [1, 1]} : vector<128x5xf32> to vector<128x1xf32>
    %61 = vector.broadcast %60 : vector<128x1xf32> to vector<128x128xf32>
    %62 = arith.mulf %59, %61 : vector<128x128xf32>
    %63 = arith.addf %55, %62 : vector<128x128xf32>
    %64 = arith.truncf %63 : vector<128x128xf32> to vector<128x128xbf16>
    %c0_56 = arith.constant 0 : index
    %c0_57 = arith.constant 0 : index
    %65 = vector.load %arg5[%c0_56, %c0_57] : memref<128x128xbf16, #tpu.memory_space<vmem>>, vector<128x128xbf16>
    %cst_58 = arith.constant dense<0.000000e+00> : vector<128x128xf32>
    %66 = tpu.matmul %64, %65, %cst_58 {dimension_numbers = #tpu.dot_dimension_numbers<[1], [0], [0], [1], [0, 0, 1, 1], [], []>} : vector<128x128xbf16>, vector<128x128xbf16>, vector<128x128xf32> -> vector<128x128xf32>
    %67 = arith.addf %15, %66 : vector<128x128xf32>
    %cst_59 = arith.constant 0.000000e+00 : f32
    %68 = vector.broadcast %cst_59 : f32 to vector<128x128xf32>
    %69 = arith.maximumf %67, %68 : vector<128x128xf32>
    %c0_60 = arith.constant 0 : index
    %c0_61 = arith.constant 0 : index
    %70 = vector.load %arg6[%c0_60, %c0_61] : memref<128x128xf32, #tpu.memory_space<vmem>>, vector<128x128xf32>
    tpu.vector_store %arg6[%c0_60, %c0_61], %69 {strides = array<i32>} : memref<128x128xf32, #tpu.memory_space<vmem>>, vector<128x128xf32>,
    return
  }
  func.func @transform_1(%arg0: i32, %arg1: memref<1536xi32, #tpu.memory_space<smem>>) -> (i32, i32) {
    %c0_i32 = arith.constant 0 : i32
    %c0_i32_0 = arith.constant 0 : i32
    return %arg0, %c0_i32 : i32, i32
  }
  func.func @transform_2(%arg0: i32, %arg1: memref<1536xi32, #tpu.memory_space<smem>>) -> (i32, i32) {
    %c0_i32 = arith.constant 0 : i32
    %c0_i32_0 = arith.constant 0 : i32
    %c0_i32_1 = arith.constant 0 : i32
    return %c0_i32, %c0_i32_0 : i32, i32
  }
  func.func @transform_3(%arg0: i32, %arg1: memref<1536xi32, #tpu.memory_space<smem>>) -> (i32, i32) {
    %c0_i32 = arith.constant 0 : i32
    %c0_i32_0 = arith.constant 0 : i32
    %c0_i32_1 = arith.constant 0 : i32
    return %c0_i32, %c0_i32_0 : i32, i32
  }
  func.func @transform_4(%arg0: i32, %arg1: memref<1536xi32, #tpu.memory_space<smem>>) -> (i32, i32) {
    %c0_i32 = arith.constant 0 : i32
    %c0_i32_0 = arith.constant 0 : i32
    return %arg0, %c0_i32 : i32, i32
  }
}

</mosaic_0001>

<bundles_post_ra>
// kernel: tpu_custom_call.1
= control target key start
LH: loop header
LB: loop body
LE: loop exit
PB: predicated region body
PF: predicated region fallthrough
CT: control target
= control target key end

     0   :  { %s3077_s0 = inlined_call_operand.vmem [shape: s32[1536], index: 0, kind: input, shape index: {}]   ;;  %s3078_s1 = inlined_call_operand.hbm [shape: f32[512,128], index: 1, kind: input, shape index: {}]   ;;  %s3079_s2 = inlined_call_operand.vmem [shape: f32[256,5], index: 2, kind: input, shape index: {}]   ;;  %s3080_s3 = inlined_call_operand.vmem [shape: bf16[128,128], index: 3, kind: input, shape index: {}]   ;;  %s3081_s4 = inlined_call_operand.vmem [shape: bf16[128,128], index: 4, kind: input, shape index: {}]   ;;  %s3082_s5 = inlined_call_operand.hbm [shape: f32[256,128], index: 5, kind: output, shape index: {}]  }
   0x1   :  { %3103 = sst [smem:[#allocation52_spill]] %s3079_s2  ;;  %s10_s20 = sshll.u32 %s3077_s0, 4  ;;  %s11_s20 = int_to_ptr.vmem [resolvable:$true] %s10_s20 }
   0x2   :  { %s1893_s21 = scalar_lea.vmem %s11_s20, 192  ;;  %s1897_s22 = scalar_lea.vmem %s11_s20, 256 }
   0x3   :  { %p1894_p0 = scmp.ne.s32.totalorder %s11_s20, %s1893_s21  ;;  %p1898_p1 = scmp.lt.s32.totalorder %s11_s20, %s11_s20 }
   0x4   :  { %p1899_p2 = scmp.lt.s32.totalorder %s1897_s22, %s1893_s21 }
   0x6   :  { %p1900_p3 = por %p1899_p2, %p1898_p1 }
   0x8   :  { %p1901_p4 = pnand %p1900_p3, %p1894_p0 }
   0xa   :  { %1904 = shalt.err (!%p1901_p4)  }
   0xb   :  { %s2223_s23 = smov [#allocation5]  }
   0xc   :  { %13 = dma.vmem_to_smem %s11_s20, 192, %s2223_s23, [#allocation4] }
   0xd   :  { %2141 = dma.done.wait [#allocation4], 192 }
   0xe   :  { %2142 = vsyncadd [#allocation4], 4294967104 }
   0xf   :  { %15 = sfence }
  0x10   :  { %16 = vsyncpa [#allocation7], 0 }
  0x11   :  { %18 = vsyncpa [#allocation7 + $0x1], 0  ;;  %s2271_s24 = smov 0   ;;  %s2273_s25 = smov 0  }
  0x12   :  { %s2275_s0 = smov 0   ;;  %s2277_s26 = smov 0  }
  0x13 LB: > { %3104 = sst [smem:[#allocation30_spill]] %s2169_s0  ;;  %s2292_s27 = sadd.s32 4294967295, %s2173_s26   ;;  %s2173_s26 = sphi %s2277_s26, %s3168_s26   ;;  %s2169_s0 = sphi %s2275_s0, %s3170_s0   ;;  %s2165_s25 = sphi %s2273_s25, %s3172_s25   ;;  %s2161_s24 = sphi %s2271_s24, %s3171_s24  }
  0x14   : > { %s1534_s28 = sadd.s32 4294967294, %s2173_s26   ;;  %s2296_s29 = sadd.s32 1, %s2173_s26  }
  0x15   : > { %3105 = sst [smem:[#allocation31_spill]] %s2296_s29  ;;  %s99_s30 = sadd.s32 1, %s2169_s0 }
  0x16   : > { %s96_s6 = ssub.s32 %s2173_s26, %s2296_s29  ;;  %p109_p5 = scmp.ne.s32.totalorder %s2169_s0, %s2165_s25 }
  0x17   : > { %p97_p6 = scmp.eq.s32.totalorder %s96_s6, 0  ;;  %p110_p7 = scmp.eq.s32.totalorder %s2292_s27, 1 }
  0x18   : > { %p115_p8 = scmp.ne.s32.totalorder %s2165_s25, %s2161_s24  ;;  %p116_p9 = scmp.eq.s32.totalorder %s1534_s28, 1 }
  0x19   : > { %s2307_s7 = scalar_select %p97_p6, %s2169_s0, %s99_s30  }
  0x1a   : > { %p2309_p10 = por %p110_p7, %p109_p5  ;;  %p2313_p11 = por %p116_p9, %p115_p8 }
  0x1b   : > { %3106 = sst [smem:[#allocation32_spill]] %s2307_s7  ;;  %p1537_p12 = scmp.ge.s32.totalorder %s2173_s26, 1 }
  0x1c   : > { %s3108_s9 = scalar_select %p2313_p11, 1, 0 }
  0x1d   : > { %p149_p13 = scmp.lt.s32.totalorder %s2173_s26, 3 }
  0x1e   : > { %3109 = sst [smem:[#allocation33_spill]] %s3108_s9 }
  0x1f   : > { %p150_p0 = pnand %p1537_p12, %p149_p13 }
  0x21   : > { %153 = sbr.rel (%p150_p0) target bundleno = 1489 (0x5d1), region = 32 }
  0x28   : > { %s3083_s10 = sand.u32 1, %s2165_s25   ;;  %s1539_s11 = sshll.u32 %s2292_s27, 4 }
  0x29   : > { %s1538_s12 = sshll.u32 %s3083_s10, 7  ;;  %p174_p1 = scmp.lt.s32.totalorder %s1539_s11, 31 }
  0x2a   : > { %s2324_s13 = sshll.u32 %s2292_s27, 7  ;;  %s3110_s2 = sld [smem:[#allocation52_spill]] }
  0x2b   : > { %s3174_s11 = smov (!%p174_p1, %s1539_s11), 31  ;;  %s2327_s14 = ssub.s32 200, %s2324_s13 }
  0x2c   : > { %s1540_s15 = sshll.u32 %s3174_s11, 3  ;;  %p183_p2 = scmp.lt.s32.totalorder %s2327_s14, 128 }
  0x2d   : > { %s2338_s20 = scalar_lea.vmem [#allocation6], %s1538_s12  ;;  %p3087_p3 = scmp.le.s32.totalorder %s2327_s14, 0 }
  0x2e   : > { %s2336_s19 = scalar_select %p183_p2, %s2327_s14, 128 }
  0x2f   : > { %1455 = sbr.rel (%p3087_p3) target bundleno = 96 (0x60), region = 189  ;;  %s2343_s21 = smov (!%p3087_p3), 0  }
  0x30   : > { %s2333_s18 = scalar_lea.vmem %s3110_s2, %s1540_s15 }
  0x36 LB: >> { %s191_s22 = sadd.s32 %s2177_s21, %s2324_s13  ;;  %s196_s30 = scalar_lea.vmem [#allocation2], %s2177_s21  ;;  %s2177_s21 = sphi %s2343_s21, %s188_s21  }
  0x37   : >> { %s192_s23 = smul.u32 6, %s191_s22  ;;  %s204_s6 = sshll.u32 %s196_s30, 4  ;;  %s205_s6 = int_to_ptr.vmem [resolvable:$true] %s204_s6 }
  0x38   : >> { %s1907_s7 = scalar_lea.hbm %s3078_s1, 8192 }
  0x39   : >> { %s193_s28 = sld [smem:[#allocation5 + %s192_s23]] }
  0x3f   : >> { %s1543_s11 = sshll.u32 %s193_s28, 4 }
  0x40   : >> { %s195_s16 = scalar_lea.hbm %s3078_s1, %s1543_s11 }
  0x41   : >> { %s1905_s17 = scalar_lea.hbm %s195_s16, 16  ;;  %p1908_p5 = scmp.lt.u32.totalorder %s195_s16, %s3078_s1 }
  0x42   : >> { %p1906_p4 = scmp.ne.s32.totalorder %s195_s16, %s1905_s17  ;;  %p1909_p6 = scmp.lt.u32.totalorder %s1907_s7, %s1905_s17 }
  0x43   : >> { %p1911_p8 = scmp.lt.u32.totalorder %s1905_s17, %s195_s16 }
  0x44   : >> { %p1910_p7 = por %p1909_p6, %p1908_p5 }
  0x46   : >> { %p1912_p9 = por %p1911_p8, %p1910_p7 }
  0x48   : >> { %p1913_p12 = pnand %p1912_p9, %p1906_p4 }
  0x4a   : >> { %1916 = shalt.err (!%p1913_p12)  }
  0x4b   : >> { %s1917_s22 = scalar_lea.vmem %s205_s6, 16  ;;  %s2224_s23 = smov [#allocation2]  }
  0x4c   : >> { %p1918_p13 = scmp.ne.s32.totalorder %s205_s6, %s1917_s22  ;;  %s1919_s28 = sshll.u32 %s2224_s23, 4  ;;  %s1920_s28 = int_to_ptr.vmem [resolvable:$false] %s1919_s28 }
  0x4d   : >> { %s1921_s30 = scalar_lea.vmem %s1920_s28, 4096  ;;  %p1922_p0 = scmp.lt.s32.totalorder %s205_s6, %s1920_s28 }
  0x4e   : >> { %p1923_p1 = scmp.lt.s32.totalorder %s1921_s30, %s1917_s22 }
  0x50   : >> { %p1924_p2 = por %p1923_p1, %p1922_p0 }
  0x52   : >> { %p1925_p3 = pnand %p1924_p2, %p1918_p13 }
  0x54   : >> { %1928 = shalt.err (!%p1925_p3)  }
  0x55   : >> { %207 = dma.hbm_to_vmem [thread:$0]  %s195_s16, 16, %s205_s6, [#allocation3] }
  0x56   : >> { %s188_s21 = sadd.s32 1, %s2177_s21  }
  0x57   : >> { %p187_p5 = scmp.ge.s32.totalorder %s188_s21, %s2336_s19 }
  0x59   : > { %190 = sbr.rel (!%p187_p5) target bundleno = 54 (0x36), region = 195 }
  0x60 PF: > { %v2365_v0 = vld [vmem:[%s2333_s18] sm:$0xff]  ;;  %v2368_v1 = vld [vmem:[%s2333_s18 + $0x8] sm:$0xff]  ;;  %v2371_v2 = vld [vmem:[%s2333_s18 + $0x10] sm:$0xff]  ;;  %p3111_p3 = scmp.le.s32.totalorder %s2327_s14, 0 }
  0x61   : > { %v2374_v3 = vld [vmem:[%s2333_s18 + $0x18] sm:$0xff]  ;;  %v2377_v4 = vld [vmem:[%s2333_s18 + $0x20] sm:$0xff]  ;;  %v2380_v5 = vld [vmem:[%s2333_s18 + $0x28] sm:$0xff]  ;;  %s2414_s2 = smov (!%p3111_p3), 0  }
  0x62   : > { %v2383_v6 = vld [vmem:[%s2333_s18 + $0x30] sm:$0xff]  ;;  %v2386_v7 = vld [vmem:[%s2333_s18 + $0x38] sm:$0xff]  ;;  %v2389_v8 = vld [vmem:[%s2333_s18 + $0x40] sm:$0xff]  ;;  %1460 = sbr.rel (%p3111_p3) target bundleno = 148 (0x94), region = 200 }
  0x63   : > { %v2392_v9 = vld [vmem:[%s2333_s18 + $0x48] sm:$0xff]  ;;  %v2395_v10 = vld [vmem:[%s2333_s18 + $0x50] sm:$0xff]  ;;  %v2398_v11 = vld [vmem:[%s2333_s18 + $0x58] sm:$0xff] }
  0x64   : > { %v2401_v12 = vld [vmem:[%s2333_s18 + $0x60] sm:$0xff]  ;;  %v2404_v13 = vld [vmem:[%s2333_s18 + $0x68] sm:$0xff]  ;;  %v2407_v14 = vld [vmem:[%s2333_s18 + $0x70] sm:$0xff] }
  0x65   : > { %v2410_v15 = vld [vmem:[%s2333_s18 + $0x78] sm:$0xff] }
  0x69 LB: >> { %s230_s0 = sadd.s32 %s2181_s2, %s2324_s13  ;;  %s1429_s10 = scalar_lea.vmem [#allocation2], %s2181_s2  ;;  %s2181_s2 = sphi %s2414_s2, %s227_s2  }
  0x6a   : >> { %s231_s29 = smul.u32 6, %s230_s0  ;;  %s1430_s21 = scalar_lea.vmem %s1429_s10, 128 [#allocation2] }
  0x6b   : >> { %s246_s6 = sshll.u32 %s1430_s21, 4  ;;  %s1931_s28 = scalar_lea.hbm %s3078_s1, 8192  ;;  %s247_s6 = int_to_ptr.vmem [resolvable:$true] %s246_s6 }
  0x6c   : >> { %s232_s7 = sadd.s32 1, %s231_s29 }
  0x6d   : >> { %s233_s18 = sld [smem:[#allocation5 + %s232_s7]] }
  0x73   : >> { %s1545_s11 = sshll.u32 %s233_s18, 4 }
  0x74   : >> { %s235_s16 = scalar_lea.hbm %s3078_s1, %s1545_s11 }
  0x75   : >> { %s1929_s17 = scalar_lea.hbm %s235_s16, 16  ;;  %p1932_p6 = scmp.lt.u32.totalorder %s235_s16, %s3078_s1 }
  0x76   : >> { %p1930_p4 = scmp.ne.s32.totalorder %s235_s16, %s1929_s17  ;;  %p1933_p7 = scmp.lt.u32.totalorder %s1931_s28, %s1929_s17 }
  0x77   : >> { %p1935_p9 = scmp.lt.u32.totalorder %s1929_s17, %s235_s16 }
  0x78   : >> { %p1934_p8 = por %p1933_p7, %p1932_p6 }
  0x7a   : >> { %p1936_p12 = por %p1935_p9, %p1934_p8 }
  0x7c   : >> { %p1937_p13 = pnand %p1936_p12, %p1930_p4 }
  0x7e   : >> { %1940 = shalt.err (!%p1937_p13)  }
  0x7f   : >> { %s1941_s0 = scalar_lea.vmem %s247_s6, 16  ;;  %s2225_s29 = smov [#allocation2]  }
  0x80   : >> { %p1942_p0 = scmp.ne.s32.totalorder %s247_s6, %s1941_s0  ;;  %s1943_s7 = sshll.u32 %s2225_s29, 4  ;;  %s1944_s7 = int_to_ptr.vmem [resolvable:$false] %s1943_s7 }
  0x81   : >> { %s1945_s10 = scalar_lea.vmem %s1944_s7, 4096  ;;  %p1946_p1 = scmp.lt.s32.totalorder %s247_s6, %s1944_s7 }
  0x82   : >> { %p1947_p2 = scmp.lt.s32.totalorder %s1945_s10, %s1941_s0 }
  0x84   : >> { %p1948_p5 = por %p1947_p2, %p1946_p1 }
  0x86   : >> { %p1949_p3 = pnand %p1948_p5, %p1942_p0 }
  0x88   : >> { %1952 = shalt.err (!%p1949_p3)  }
  0x89   : >> { %249 = dma.hbm_to_vmem [thread:$0]  %s235_s16, 16, %s247_s6, [#allocation3 + $0x1] }
  0x8a   : >> { %s227_s2 = sadd.s32 1, %s2181_s2  }
  0x8b   : >> { %p226_p6 = scmp.ge.s32.totalorder %s227_s2, %s2336_s19 }
  0x8d   : > { %229 = sbr.rel (!%p226_p6) target bundleno = 105 (0x69), region = 206 }
  0x94 PF: > { %p3112_p4 = scmp.le.s32.totalorder %s2327_s14, 0 }
  0x95   : > { %s2183_s9 = smov (!%p3112_p4), 0  }
  0x96   : > { %1465 = sbr.rel (%p3112_p4) target bundleno = 168 (0xa8), region = 211 }
  0x9d LB: >> { %2143 = dma.done.wait [#allocation3], 16  ;;  %s2185_s9 = sphi %s2183_s9, %s253_s9  }
  0x9e   : >> { %2144 = vsyncadd [#allocation3], 4294967280  ;;  %s253_s9 = sadd.s32 1, %s2185_s9  }
  0x9f   : >> { %p252_p7 = scmp.ge.s32.totalorder %s253_s9, %s2336_s19 }
  0xa1   : > { %255 = sbr.rel (!%p252_p7) target bundleno = 157 (0x9d), region = 217 }
  0xa8 PF: > { %p3131_p8 = scmp.le.s32.totalorder %s2327_s14, 0 }
  0xa9   : > { %v2438_v16 = vld [vmem:[#allocation2] sm:$0xff]  ;;  %v2440_v17 = vld [vmem:[#allocation2 + $0x8] sm:$0xff]  ;;  %v2442_v18 = vld [vmem:[#allocation2 + $0x10] sm:$0xff]  ;;  %s2568_s29 = smov (!%p3131_p8), 0  }
  0xaa   : > { %3113 = vst [vmem:[#allocation34_spill] sm:$0xff] %v2442_v18  ;;  %v2444_v19 = vld [vmem:[#allocation2 + $0x18] sm:$0xff]  ;;  %v2446_v20 = vld [vmem:[#allocation2 + $0x20] sm:$0xff]  ;;  %v2448_v21 = vld [vmem:[#allocation2 + $0x28] sm:$0xff] }
  0xab   : > { %3114 = vst [vmem:[#allocation35_spill] sm:$0xff] %v2444_v19  ;;  %3115 = vst [vmem:[#allocation36_spill] sm:$0xff] %v2446_v20  ;;  %v2452_v23 = vld [vmem:[#allocation2 + $0x30] sm:$0xff]  ;;  %v2454_v24 = vld [vmem:[#allocation2 + $0x38] sm:$0xff] }
  0xac   : > { %3116 = vst [vmem:[#allocation37_spill] sm:$0xff] %v2448_v21  ;;  %3117 = vst [vmem:[#allocation38_spill] sm:$0xff] %v2452_v23  ;;  %v2456_v25 = vld [vmem:[#allocation2 + $0x40] sm:$0xff]  ;;  %v2462_v28 = vld [vmem:[#allocation2 + $0x48] sm:$0xff] }
  0xad   : > { %3118 = vst [vmem:[#allocation39_spill] sm:$0xff] %v2454_v24  ;;  %3119 = vst [vmem:[#allocation40_spill] sm:$0xff] %v2456_v25  ;;  %v2464_v29 = vld [vmem:[#allocation2 + $0x50] sm:$0xff]  ;;  %v2466_v30 = vld [vmem:[#allocation2 + $0x58] sm:$0xff] }
  0xae   : > { %3120 = vst [vmem:[#allocation41_spill] sm:$0xff] %v2462_v28  ;;  %3121 = vst [vmem:[#allocation42_spill] sm:$0xff] %v2464_v29  ;;  %v2470_v32 = vld [vmem:[#allocation2 + $0x60] sm:$0xff]  ;;  %v2472_v33 = vld [vmem:[#allocation2 + $0x68] sm:$0xff] }
  0xaf   : > { %3122 = vst [vmem:[#allocation43_spill] sm:$0xff] %v2466_v30  ;;  %3123 = vst [vmem:[#allocation44_spill] sm:$0xff] %v2470_v32  ;;  %v2474_v34 = vld [vmem:[#allocation2 + $0x70] sm:$0xff]  ;;  %v2480_v37 = vld [vmem:[#allocation2 + $0x78] sm:$0xff] }
  0xb0   : > { %3124 = vst [vmem:[#allocation45_spill] sm:$0xff] %v2472_v33  ;;  %3125 = vst [vmem:[#allocation46_spill] sm:$0xff] %v2474_v34  ;;  %v2487_v39 = vld [vmem:[%s3080_s3] sm:$0xf]  ;;  %v2492_v40 = vld [vmem:[%s3080_s3 + $0x4] sm:$0xf] }
  0xb1   : > { %3126 = vst [vmem:[#allocation47_spill] sm:$0xff] %v2480_v37  ;;  %v2499_v42 = vld [vmem:[%s3080_s3 + $0x8] sm:$0xf]  ;;  %v2504_v43 = vld [vmem:[%s3080_s3 + $0xc] sm:$0xf]  ;;  %1470 = sbr.rel (%p3131_p8) target bundleno = 227 (0xe3), region = 222 }
  0xb2   : > { %v2509_v44 = vld [vmem:[%s3080_s3 + $0x10] sm:$0xf]  ;;  %v2514_v45 = vld [vmem:[%s3080_s3 + $0x14] sm:$0xf]  ;;  %v2519_v46 = vld [vmem:[%s3080_s3 + $0x18] sm:$0xf] }
  0xb3   : > { %v2524_v47 = vld [vmem:[%s3080_s3 + $0x1c] sm:$0xf]  ;;  %v2529_v48 = vld [vmem:[%s3080_s3 + $0x20] sm:$0xf]  ;;  %v2534_v49 = vld [vmem:[%s3080_s3 + $0x24] sm:$0xf] }
  0xb4   : > { %v2539_v50 = vld [vmem:[%s3080_s3 + $0x28] sm:$0xf]  ;;  %v2544_v51 = vld [vmem:[%s3080_s3 + $0x2c] sm:$0xf]  ;;  %v2549_v52 = vld [vmem:[%s3080_s3 + $0x30] sm:$0xf] }
  0xb5   : > { %3127 = vst [vmem:[#allocation48_spill] sm:$0xff] %v2549_v52  ;;  %v2554_v53 = vld [vmem:[%s3080_s3 + $0x34] sm:$0xf]  ;;  %v2559_v54 = vld [vmem:[%s3080_s3 + $0x38] sm:$0xf] }
  0xb6   : > { %3128 = vst [vmem:[#allocation49_spill] sm:$0xff] %v2554_v53  ;;  %3129 = vst [vmem:[#allocation50_spill] sm:$0xff] %v2559_v54  ;;  %v2564_v55 = vld [vmem:[%s3080_s3 + $0x3c] sm:$0xf] }
  0xb7   : > { %3130 = vst [vmem:[#allocation51_spill] sm:$0xff] %v2564_v55 }
  0xb8 LB: >> { %s304_s7 = sadd.s32 %s2189_s29, %s2324_s13  ;;  %s310_s21 = scalar_lea.vmem [#allocation2], %s2189_s29  ;;  %s2189_s29 = sphi %s2568_s29, %s301_s29  }
  0xb9   : >> { %s305_s10 = smul.u32 6, %s304_s7  ;;  %s318_s18 = sshll.u32 %s310_s21, 4  ;;  %s319_s18 = int_to_ptr.vmem [resolvable:$true] %s318_s18 }
  0xba   : >> { %s1955_s23 = scalar_lea.hbm %s3078_s1, 8192 }
  0xbb   : >> { %s306_s9 = sadd.s32 2, %s305_s10 }
  0xbc   : >> { %s307_s2 = sld [smem:[#allocation5 + %s306_s9]] }
  0xc2   : >> { %s1548_s6 = sshll.u32 %s307_s2, 4 }
  0xc3   : >> { %s309_s15 = scalar_lea.hbm %s3078_s1, %s1548_s6 }
  0xc4   : >> { %s1953_s16 = scalar_lea.hbm %s309_s15, 16  ;;  %p1956_p12 = scmp.lt.u32.totalorder %s309_s15, %s3078_s1 }
  0xc5   : >> { %p1954_p9 = scmp.ne.s32.totalorder %s309_s15, %s1953_s16  ;;  %p1957_p13 = scmp.lt.u32.totalorder %s1955_s23, %s1953_s16 }
  0xc6   : >> { %p1959_p1 = scmp.lt.u32.totalorder %s1953_s16, %s309_s15 }
  0xc7   : >> { %p1958_p0 = por %p1957_p13, %p1956_p12 }
  0xc9   : >> { %p1960_p2 = por %p1959_p1, %p1958_p0 }
  0xcb   : >> { %p1961_p5 = pnand %p1960_p2, %p1954_p9 }
  0xcd   : >> { %1964 = shalt.err (!%p1961_p5)  }
  0xce   : >> { %s1965_s0 = scalar_lea.vmem %s319_s18, 16  ;;  %s2226_s7 = smov [#allocation2]  }
  0xcf   : >> { %p1966_p3 = scmp.ne.s32.totalorder %s319_s18, %s1965_s0  ;;  %s1967_s10 = sshll.u32 %s2226_s7, 4  ;;  %s1968_s10 = int_to_ptr.vmem [resolvable:$false] %s1967_s10 }
  0xd0   : >> { %s1969_s9 = scalar_lea.vmem %s1968_s10, 4096  ;;  %p1970_p6 = scmp.lt.s32.totalorder %s319_s18, %s1968_s10 }
  0xd1   : >> { %p1971_p4 = scmp.lt.s32.totalorder %s1969_s9, %s1965_s0 }
  0xd3   : >> { %p1972_p7 = por %p1971_p4, %p1970_p6 }
  0xd5   : >> { %p1973_p8 = pnand %p1972_p7, %p1966_p3 }
  0xd7   : >> { %1976 = shalt.err (!%p1973_p8)  }
  0xd8   : >> { %321 = dma.hbm_to_vmem [thread:$0]  %s309_s15, 16, %s319_s18, [#allocation3] }
  0xd9   : >> { %s301_s29 = sadd.s32 1, %s2189_s29  }
  0xda   : >> { %p300_p12 = scmp.ge.s32.totalorder %s301_s29, %s2336_s19 }
  0xdc   : > { %303 = sbr.rel (!%p300_p12) target bundleno = 184 (0xb8), region = 228 }
  0xe3 PF: > { %p3132_p9 = scmp.le.s32.totalorder %s2327_s14, 0 }
  0xe4   : > { %s2191_s2 = smov (!%p3132_p9), 0  }
  0xe5   : > { %1475 = sbr.rel (%p3132_p9) target bundleno = 247 (0xf7), region = 233 }
  0xec LB: >> { %2145 = dma.done.wait [#allocation3 + $0x1], 16  ;;  %s2193_s2 = sphi %s2191_s2, %s325_s2  }
  0xed   : >> { %2146 = vsyncadd [#allocation3 + $0x1], 4294967280  ;;  %s325_s2 = sadd.s32 1, %s2193_s2  }
  0xee   : >> { %p324_p13 = scmp.ge.s32.totalorder %s325_s2, %s2336_s19 }
  0xf0   : > { %327 = sbr.rel (!%p324_p13) target bundleno = 236 (0xec), region = 239 }
  0xf7 PF: > { %v2227_v56 = vmov 0   ;;  %p3133_p0 = scmp.le.s32.totalorder %s2327_s14, 0 }
  0xf8   : > { %1876 = vset.pattern.permute.xlu1 %v2227_v56  ;;  %1875 = vset.pattern.permute.xlu0 %v2227_v56  ;;  %v334_v57 = vld [vmem:[#allocation2 + $0x90] sm:$0xff]  ;;  %v332_v58 = vld [vmem:[#allocation2 + $0x80] sm:$0xff]  ;;  %v335_v63 = vld [vmem:[#allocation2 + $0x98] sm:$0xff]  ;;  %s2642_s29 = smov (!%p3133_p0), 0  }
  0xf9   : > { %360 = vperm.xlu1 %1876, %v2371_v2   ;;  %350 = vperm.xlu0 %1875, %v2365_v0   ;;  %v333_v56 = vld [vmem:[#allocation2 + $0x88] sm:$0xff]  ;;  %v336_v27 = vld [vmem:[#allocation2 + $0xa0] sm:$0xff] }
  0xfa   : > { %v337_v31 = vld [vmem:[#allocation2 + $0xa8] sm:$0xff] }
  0xfd   : > { %365 = vperm.xlu1 %1876, %v2374_v3   ;;  %355 = vperm.xlu0 %1875, %v2368_v1  }
 0x101   : > { %375 = vperm.xlu1 %1876, %v2380_v5   ;;  %370 = vperm.xlu0 %1875, %v2377_v4  }
 0x105   : > { %385 = vperm.xlu1 %1876, %v2386_v7   ;;  %380 = vperm.xlu0 %1875, %v2383_v6  }
 0x109   : > { %395 = vperm.xlu1 %1876, %v2392_v9   ;;  %390 = vperm.xlu0 %1875, %v2389_v8  }
 0x10d   : > { %405 = vperm.xlu1 %1876, %v2398_v11   ;;  %400 = vperm.xlu0 %1875, %v2395_v10  }
 0x111   : > { %415 = vperm.xlu1 %1876, %v2404_v13   ;;  %410 = vperm.xlu0 %1875, %v2401_v12  }
 0x115   : > { %425 = vperm.xlu1 %1876, %v2410_v15   ;;  %420 = vperm.xlu0 %1875, %v2407_v14  }
 0x178   : > { %v361_v59 = vpop.permute.xlu1 %360  ;;  %v351_v60 = vpop.permute.xlu0 %350 }
 0x179   : > { %v2608_v61 = vmul.f32 %v361_v59, %v334_v57  ;;  %v2610_v62 = vmul.f32 %v351_v60, %v332_v58  ;;  %v339_v57 = vld [vmem:[#allocation2 + $0xb8] sm:$0xff]  ;;  %v338_v59 = vld [vmem:[#allocation2 + $0xb0] sm:$0xff] }
 0x17c   : > { %v366_v41 = vpop.permute.xlu1 %365  ;;  %v356_v38 = vpop.permute.xlu0 %355 }
 0x17d   : > { %v2612_v36 = vmul.f32 %v366_v41, %v335_v63  ;;  %v2614_v35 = vmul.f32 %v356_v38, %v333_v56  ;;  %v341_v41 = vld [vmem:[#allocation2 + $0xc8] sm:$0xff]  ;;  %v340_v63 = vld [vmem:[#allocation2 + $0xc0] sm:$0xff] }
 0x180   : > { %v376_v26 = vpop.permute.xlu1 %375  ;;  %v371_v22 = vpop.permute.xlu0 %370 }
 0x181   : > { %v2616_v34 = vmul.f32 %v376_v26, %v337_v31  ;;  %v2618_v37 = vmul.f32 %v371_v22, %v336_v27  ;;  %v343_v26 = vld [vmem:[#allocation2 + $0xd8] sm:$0xff]  ;;  %v342_v31 = vld [vmem:[#allocation2 + $0xd0] sm:$0xff] }
 0x184   : > { %v386_v58 = vpop.permute.xlu1 %385  ;;  %v381_v60 = vpop.permute.xlu0 %380 }
 0x185   : > { %v2620_v32 = vmul.f32 %v386_v58, %v339_v57  ;;  %v2622_v33 = vmul.f32 %v381_v60, %v338_v59  ;;  %v345_v57 = vld [vmem:[#allocation2 + $0xe8] sm:$0xff]  ;;  %v344_v58 = vld [vmem:[#allocation2 + $0xe0] sm:$0xff] }
 0x188   : > { %v396_v38 = vpop.permute.xlu1 %395  ;;  %v391_v56 = vpop.permute.xlu0 %390 }
 0x189   : > { %v2624_v29 = vmul.f32 %v396_v38, %v341_v41  ;;  %v2626_v30 = vmul.f32 %v391_v56, %v340_v63  ;;  %v347_v41 = vld [vmem:[#allocation2 + $0xf8] sm:$0xff]  ;;  %v346_v38 = vld [vmem:[#allocation2 + $0xf0] sm:$0xff] }
 0x18c   : > { %v406_v22 = vpop.permute.xlu1 %405  ;;  %v401_v27 = vpop.permute.xlu0 %400 }
 0x18d   : > { %v2628_v25 = vmul.f32 %v406_v22, %v343_v26  ;;  %v2630_v28 = vmul.f32 %v401_v27, %v342_v31 }
 0x18f   : > { %1480 = sbr.rel (%p3133_p0) target bundleno = 449 (0x1c1), region = 244 }
 0x190   : > { %v416_v59 = vpop.permute.xlu1 %415  ;;  %v411_v60 = vpop.permute.xlu0 %410 }
 0x191   : > { %v2632_v23 = vmul.f32 %v416_v59, %v345_v57  ;;  %v2634_v24 = vmul.f32 %v411_v60, %v344_v58 }
 0x194   : > { %v426_v63 = vpop.permute.xlu1 %425  ;;  %v421_v56 = vpop.permute.xlu0 %420 }
 0x195   : > { %v2636_v20 = vmul.f32 %v426_v63, %v347_v41  ;;  %v2638_v21 = vmul.f32 %v421_v56, %v346_v38 }
 0x196 LB: >> { %s466_s21 = sadd.s32 %s2197_s29, %s2324_s13  ;;  %s1436_s11 = scalar_lea.vmem [#allocation2], %s2197_s29  ;;  %s2197_s29 = sphi %s2642_s29, %s463_s29  }
 0x197   : >> { %s467_s18 = smul.u32 6, %s466_s21  ;;  %s1437_s12 = scalar_lea.vmem %s1436_s11, 128 [#allocation2] }
 0x198   : >> { %s482_s16 = sshll.u32 %s1437_s12, 4  ;;  %s1979_s10 = scalar_lea.hbm %s3078_s1, 8192  ;;  %s483_s16 = int_to_ptr.vmem [resolvable:$true] %s482_s16 }
 0x199   : >> { %s468_s6 = sadd.s32 3, %s467_s18 }
 0x19a   : >> { %s469_s15 = sld [smem:[#allocation5 + %s468_s6]] }
 0x1a0   : >> { %s1551_s17 = sshll.u32 %s469_s15, 4 }
 0x1a1   : >> { %s471_s28 = scalar_lea.hbm %s3078_s1, %s1551_s17 }
 0x1a2   : >> { %s1977_s30 = scalar_lea.hbm %s471_s28, 16  ;;  %p1980_p2 = scmp.lt.u32.totalorder %s471_s28, %s3078_s1 }
 0x1a3   : >> { %p1978_p1 = scmp.ne.s32.totalorder %s471_s28, %s1977_s30  ;;  %p1981_p5 = scmp.lt.u32.totalorder %s1979_s10, %s1977_s30 }
 0x1a4   : >> { %p1983_p6 = scmp.lt.u32.totalorder %s1977_s30, %s471_s28 }
 0x1a5   : >> { %p1982_p3 = por %p1981_p5, %p1980_p2 }
 0x1a7   : >> { %p1984_p4 = por %p1983_p6, %p1982_p3 }
 0x1a9   : >> { %p1985_p7 = pnand %p1984_p4, %p1978_p1 }
 0x1ab   : >> { %1988 = shalt.err (!%p1985_p7)  }
 0x1ac   : >> { %s1989_s21 = scalar_lea.vmem %s483_s16, 16  ;;  %s2228_s18 = smov [#allocation2]  }
 0x1ad   : >> { %p1990_p8 = scmp.ne.s32.totalorder %s483_s16, %s1989_s21  ;;  %s1991_s6 = sshll.u32 %s2228_s18, 4  ;;  %s1992_s6 = int_to_ptr.vmem [resolvable:$false] %s1991_s6 }
 0x1ae   : >> { %s1993_s11 = scalar_lea.vmem %s1992_s6, 4096  ;;  %p1994_p12 = scmp.lt.s32.totalorder %s483_s16, %s1992_s6 }
 0x1af   : >> { %p1995_p9 = scmp.lt.s32.totalorder %s1993_s11, %s1989_s21 }
 0x1b1   : >> { %p1996_p13 = por %p1995_p9, %p1994_p12 }
 0x1b3   : >> { %p1997_p0 = pnand %p1996_p13, %p1990_p8 }
 0x1b5   : >> { %2000 = shalt.err (!%p1997_p0)  }
 0x1b6   : >> { %485 = dma.hbm_to_vmem [thread:$0]  %s471_s28, 16, %s483_s16, [#allocation3 + $0x1] }
 0x1b7   : >> { %s463_s29 = sadd.s32 1, %s2197_s29  }
 0x1b8   : >> { %p462_p2 = scmp.ge.s32.totalorder %s463_s29, %s2336_s19 }
 0x1ba   : > { %465 = sbr.rel (!%p462_p2) target bundleno = 406 (0x196), region = 250 }
 0x1c1 PF: > { %p3134_p1 = scmp.le.s32.totalorder %s2327_s14, 0 }
 0x1c2   : > { %s2199_s12 = smov (!%p3134_p1), 0  }
 0x1c3   : > { %1485 = sbr.rel (%p3134_p1) target bundleno = 469 (0x1d5), region = 255 }
 0x1ca LB: >> { %2147 = dma.done.wait [#allocation3], 16  ;;  %s2201_s12 = sphi %s2199_s12, %s489_s12  }
 0x1cb   : >> { %2148 = vsyncadd [#allocation3], 4294967280  ;;  %s489_s12 = sadd.s32 1, %s2201_s12  }
 0x1cc   : >> { %p488_p5 = scmp.ge.s32.totalorder %s489_s12, %s2336_s19 }
 0x1ce   : > { %491 = sbr.rel (!%p488_p5) target bundleno = 458 (0x1ca), region = 261 }
 0x1d5 PF: > { %v2229_v26 = vmov 1   ;;  %p3135_p3 = scmp.le.s32.totalorder %s2327_s14, 0 }
 0x1d6   : > { %1878 = vset.pattern.permute.xlu1 %v2229_v26  ;;  %1877 = vset.pattern.permute.xlu0 %v2229_v26  ;;  %v496_v31 = vld [vmem:[#allocation2 + $0x10] sm:$0xff]  ;;  %v494_v22 = vld [vmem:[#allocation2] sm:$0xff]  ;;  %v497_v60 = vld [vmem:[#allocation2 + $0x18] sm:$0xff]  ;;  %s2732_s29 = smov (!%p3135_p3), 0  }
 0x1d7   : > { %519 = vperm.xlu1 %1878, %v2371_v2   ;;  %511 = vperm.xlu0 %1877, %v2365_v0   ;;  %v495_v41 = vld [vmem:[#allocation2 + $0x8] sm:$0xff]  ;;  %v498_v55 = vld [vmem:[#allocation2 + $0x20] sm:$0xff]  ;;  %v500_v53 = vld [vmem:[#allocation2 + $0x30] sm:$0xff] }
 0x1d8   : > { %v499_v54 = vld [vmem:[#allocation2 + $0x28] sm:$0xff] }
 0x1db   : > { %523 = vperm.xlu1 %1878, %v2374_v3   ;;  %515 = vperm.xlu0 %1877, %v2368_v1  }
 0x1df   : > { %531 = vperm.xlu1 %1878, %v2380_v5   ;;  %527 = vperm.xlu0 %1877, %v2377_v4  }
 0x1e3   : > { %539 = vperm.xlu1 %1878, %v2386_v7   ;;  %535 = vperm.xlu0 %1877, %v2383_v6  }
 0x1e7   : > { %547 = vperm.xlu1 %1878, %v2392_v9   ;;  %543 = vperm.xlu0 %1877, %v2389_v8  }
 0x1eb   : > { %555 = vperm.xlu1 %1878, %v2398_v11   ;;  %551 = vperm.xlu0 %1877, %v2395_v10  }
 0x1ef   : > { %563 = vperm.xlu1 %1878, %v2404_v13   ;;  %559 = vperm.xlu0 %1877, %v2401_v12  }
 0x1f3   : > { %571 = vperm.xlu1 %1878, %v2410_v15   ;;  %567 = vperm.xlu0 %1877, %v2407_v14  }
 0x256   : > { %v520_v27 = vpop.permute.xlu1 %519  ;;  %v512_v57 = vpop.permute.xlu0 %511 }
 0x257   : > { %v576_v58 = vmul.f32 %v520_v27, %v496_v31  ;;  %v574_v59 = vmul.f32 %v512_v57, %v494_v22 }
 0x259   : > { %v2683_v38 = vadd.f32 %v576_v58, %v2608_v61  ;;  %v2686_v63 = vadd.f32 %v574_v59, %v2610_v62  ;;  %v501_v58 = vld [vmem:[#allocation2 + $0x38] sm:$0xff] }
 0x25a   : > { %v524_v56 = vpop.permute.xlu1 %523  ;;  %v516_v26 = vpop.permute.xlu0 %515 }
 0x25b   : > { %v577_v18 = vmul.f32 %v524_v56, %v497_v60  ;;  %v575_v19 = vmul.f32 %v516_v26, %v495_v41  ;;  %v502_v26 = vld [vmem:[#allocation2 + $0x40] sm:$0xff] }
 0x25d   : > { %v2689_v52 = vadd.f32 %v577_v18, %v2612_v36  ;;  %v2692_v31 = vadd.f32 %v575_v19, %v2614_v35  ;;  %v503_v36 = vld [vmem:[#allocation2 + $0x48] sm:$0xff] }
 0x25e   : > { %v532_v22 = vpop.permute.xlu1 %531  ;;  %v528_v27 = vpop.permute.xlu0 %527 }
 0x25f   : > { %v579_v57 = vmul.f32 %v532_v22, %v499_v54  ;;  %v578_v61 = vmul.f32 %v528_v27, %v498_v55  ;;  %v505_v27 = vld [vmem:[#allocation2 + $0x58] sm:$0xff] }
 0x261   : > { %v2695_v62 = vadd.f32 %v579_v57, %v2616_v34  ;;  %v2698_v59 = vadd.f32 %v578_v61, %v2618_v37  ;;  %v504_v57 = vld [vmem:[#allocation2 + $0x50] sm:$0xff] }
 0x262   : > { %v540_v60 = vpop.permute.xlu1 %539  ;;  %v536_v41 = vpop.permute.xlu0 %535 }
 0x263   : > { %v581_v56 = vmul.f32 %v540_v60, %v501_v58  ;;  %v580_v18 = vmul.f32 %v536_v41, %v500_v53  ;;  %v507_v41 = vld [vmem:[#allocation2 + $0x68] sm:$0xff] }
 0x265   : > { %v2701_v19 = vadd.f32 %v581_v56, %v2620_v32  ;;  %v2704_v35 = vadd.f32 %v580_v18, %v2622_v33  ;;  %v506_v56 = vld [vmem:[#allocation2 + $0x60] sm:$0xff] }
 0x266   : > { %v548_v54 = vpop.permute.xlu1 %547  ;;  %v544_v55 = vpop.permute.xlu0 %543 }
 0x267   : > { %v583_v22 = vmul.f32 %v548_v54, %v503_v36  ;;  %v582_v34 = vmul.f32 %v544_v55, %v502_v26  ;;  %v509_v55 = vld [vmem:[#allocation2 + $0x78] sm:$0xff] }
 0x269   : > { %v2707_v37 = vadd.f32 %v583_v22, %v2624_v29  ;;  %v2710_v61 = vadd.f32 %v582_v34, %v2626_v30  ;;  %v508_v22 = vld [vmem:[#allocation2 + $0x70] sm:$0xff] }
 0x26a   : > { %v556_v53 = vpop.permute.xlu1 %555  ;;  %v552_v58 = vpop.permute.xlu0 %551 }
 0x26b   : > { %v585_v60 = vmul.f32 %v556_v53, %v505_v27  ;;  %v584_v32 = vmul.f32 %v552_v58, %v504_v57 }
 0x26d   : > { %v2713_v33 = vadd.f32 %v585_v60, %v2628_v25  ;;  %v2716_v18 = vadd.f32 %v584_v32, %v2630_v28 }
 0x26e   : > { %v564_v36 = vpop.permute.xlu1 %563  ;;  %v560_v26 = vpop.permute.xlu0 %559 }
 0x26f   : > { %v587_v54 = vmul.f32 %v564_v36, %v507_v41  ;;  %v586_v29 = vmul.f32 %v560_v26, %v506_v56  ;;  %1490 = sbr.rel (%p3135_p3) target bundleno = 673 (0x2a1), region = 266 }
 0x271   : > { %v2719_v30 = vadd.f32 %v587_v54, %v2632_v23  ;;  %v2722_v34 = vadd.f32 %v586_v29, %v2634_v24 }
 0x272   : > { %v572_v27 = vpop.permute.xlu1 %571  ;;  %v568_v57 = vpop.permute.xlu0 %567 }
 0x273   : > { %v589_v53 = vmul.f32 %v572_v27, %v509_v55  ;;  %v588_v25 = vmul.f32 %v568_v57, %v508_v22 }
 0x275   : > { %v2725_v58 = vadd.f32 %v589_v53, %v2636_v20  ;;  %v2728_v28 = vadd.f32 %v588_v25, %v2638_v21 }
 0x276 LB: >> { %s612_s15 = sadd.s32 %s2205_s29, %s2324_s13  ;;  %s618_s23 = scalar_lea.vmem [#allocation2], %s2205_s29  ;;  %s2205_s29 = sphi %s2732_s29, %s609_s29  }
 0x277   : >> { %s613_s16 = smul.u32 6, %s612_s15  ;;  %s626_s28 = sshll.u32 %s618_s23, 4  ;;  %s627_s28 = int_to_ptr.vmem [resolvable:$true] %s626_s28 }
 0x278   : >> { %s2003_s18 = scalar_lea.hbm %s3078_s1, 8192 }
 0x279   : >> { %s614_s17 = sadd.s32 4, %s613_s16 }
 0x27a   : >> { %s615_s22 = sld [smem:[#allocation5 + %s614_s17]] }
 0x280   : >> { %s1554_s30 = sshll.u32 %s615_s22, 4 }
 0x281   : >> { %s617_s10 = scalar_lea.hbm %s3078_s1, %s1554_s30 }
 0x282   : >> { %s2001_s9 = scalar_lea.hbm %s617_s10, 16  ;;  %p2004_p4 = scmp.lt.u32.totalorder %s617_s10, %s3078_s1 }
 0x283   : >> { %p2002_p6 = scmp.ne.s32.totalorder %s617_s10, %s2001_s9  ;;  %p2005_p7 = scmp.lt.u32.totalorder %s2003_s18, %s2001_s9 }
 0x284   : >> { %p2007_p12 = scmp.lt.u32.totalorder %s2001_s9, %s617_s10 }
 0x285   : >> { %p2006_p8 = por %p2005_p7, %p2004_p4 }
 0x287   : >> { %p2008_p9 = por %p2007_p12, %p2006_p8 }
 0x289   : >> { %p2009_p13 = pnand %p2008_p9, %p2002_p6 }
 0x28b   : >> { %2012 = shalt.err (!%p2009_p13)  }
 0x28c   : >> { %s2013_s12 = scalar_lea.vmem %s627_s28, 16  ;;  %s2230_s15 = smov [#allocation2]  }
 0x28d   : >> { %p2014_p0 = scmp.ne.s32.totalorder %s627_s28, %s2013_s12  ;;  %s2015_s16 = sshll.u32 %s2230_s15, 4  ;;  %s2016_s16 = int_to_ptr.vmem [resolvable:$false] %s2015_s16 }
 0x28e   : >> { %s2017_s17 = scalar_lea.vmem %s2016_s16, 4096  ;;  %p2018_p2 = scmp.lt.s32.totalorder %s627_s28, %s2016_s16 }
 0x28f   : >> { %p2019_p1 = scmp.lt.s32.totalorder %s2017_s17, %s2013_s12 }
 0x291   : >> { %p2020_p5 = por %p2019_p1, %p2018_p2 }
 0x293   : >> { %p2021_p3 = pnand %p2020_p5, %p2014_p0 }
 0x295   : >> { %2024 = shalt.err (!%p2021_p3)  }
 0x296   : >> { %629 = dma.hbm_to_vmem [thread:$0]  %s617_s10, 16, %s627_s28, [#allocation3] }
 0x297   : >> { %s609_s29 = sadd.s32 1, %s2205_s29  }
 0x298   : >> { %p608_p4 = scmp.ge.s32.totalorder %s609_s29, %s2336_s19 }
 0x29a   : > { %611 = sbr.rel (!%p608_p4) target bundleno = 630 (0x276), region = 272 }
 0x2a1 PF: > { %p3136_p6 = scmp.le.s32.totalorder %s2327_s14, 0 }
 0x2a2   : > { %s2207_s22 = smov (!%p3136_p6), 0  }
 0x2a3   : > { %1495 = sbr.rel (%p3136_p6) target bundleno = 693 (0x2b5), region = 277 }
 0x2aa LB: >> { %2149 = dma.done.wait [#allocation3 + $0x1], 16  ;;  %s2209_s22 = sphi %s2207_s22, %s633_s22  }
 0x2ab   : >> { %2150 = vsyncadd [#allocation3 + $0x1], 4294967280  ;;  %s633_s22 = sadd.s32 1, %s2209_s22  }
 0x2ac   : >> { %p632_p7 = scmp.ge.s32.totalorder %s633_s22, %s2336_s19 }
 0x2ae   : > { %635 = sbr.rel (!%p632_p7) target bundleno = 682 (0x2aa), region = 283 }
 0x2b5 PF: > { %v2231_v20 = vmov 2   ;;  %p3137_p8 = scmp.le.s32.totalorder %s2327_s14, 0 }
 0x2b6   : > { %1880 = vset.pattern.permute.xlu1 %v2231_v20  ;;  %1879 = vset.pattern.permute.xlu0 %v2231_v20  ;;  %v641_v21 = vld [vmem:[#allocation2 + $0x90] sm:$0xff]  ;;  %v639_v23 = vld [vmem:[#allocation2 + $0x80] sm:$0xff]  ;;  %v642_v56 = vld [vmem:[#allocation2 + $0x98] sm:$0xff]  ;;  %s2822_s29 = smov (!%p3137_p8), 0  }
 0x2b7   : > { %664 = vperm.xlu1 %1880, %v2371_v2   ;;  %656 = vperm.xlu0 %1879, %v2365_v0   ;;  %v640_v36 = vld [vmem:[#allocation2 + $0x88] sm:$0xff]  ;;  %v643_v53 = vld [vmem:[#allocation2 + $0xa0] sm:$0xff] }
 0x2b8   : > { %v644_v57 = vld [vmem:[#allocation2 + $0xa8] sm:$0xff] }
 0x2bb   : > { %668 = vperm.xlu1 %1880, %v2374_v3   ;;  %660 = vperm.xlu0 %1879, %v2368_v1  }
 0x2bf   : > { %676 = vperm.xlu1 %1880, %v2380_v5   ;;  %672 = vperm.xlu0 %1879, %v2377_v4  }
 0x2c3   : > { %684 = vperm.xlu1 %1880, %v2386_v7   ;;  %680 = vperm.xlu0 %1879, %v2383_v6  }
 0x2c7   : > { %692 = vperm.xlu1 %1880, %v2392_v9   ;;  %688 = vperm.xlu0 %1879, %v2389_v8  }
 0x2cb   : > { %700 = vperm.xlu1 %1880, %v2398_v11   ;;  %696 = vperm.xlu0 %1879, %v2395_v10  }
 0x2cf   : > { %708 = vperm.xlu1 %1880, %v2404_v13   ;;  %704 = vperm.xlu0 %1879, %v2401_v12  }
 0x2d3   : > { %716 = vperm.xlu1 %1880, %v2410_v15   ;;  %712 = vperm.xlu0 %1879, %v2407_v14  }
 0x336   : > { %v665_v24 = vpop.permute.xlu1 %664  ;;  %v657_v60 = vpop.permute.xlu0 %656 }
 0x337   : > { %v721_v32 = vmul.f32 %v665_v24, %v641_v21  ;;  %v719_v41 = vmul.f32 %v657_v60, %v639_v23  ;;  %v646_v60 = vld [vmem:[#allocation2 + $0xb8] sm:$0xff] }
 0x339   : > { %v2773_v26 = vadd.f32 %v721_v32, %v2683_v38  ;;  %v2776_v54 = vadd.f32 %v719_v41, %v2686_v63  ;;  %v645_v32 = vld [vmem:[#allocation2 + $0xb0] sm:$0xff] }
 0x33a   : > { %v669_v29 = vpop.permute.xlu1 %668  ;;  %v661_v55 = vpop.permute.xlu0 %660 }
 0x33b   : > { %v722_v22 = vmul.f32 %v669_v29, %v642_v56  ;;  %v720_v27 = vmul.f32 %v661_v55, %v640_v36  ;;  %v648_v55 = vld [vmem:[#allocation2 + $0xc8] sm:$0xff] }
 0x33d   : > { %v2779_v25 = vadd.f32 %v722_v22, %v2689_v52  ;;  %v2782_v20 = vadd.f32 %v720_v27, %v2692_v31  ;;  %v647_v22 = vld [vmem:[#allocation2 + $0xc0] sm:$0xff] }
 0x33e   : > { %v677_v21 = vpop.permute.xlu1 %676  ;;  %v673_v23 = vpop.permute.xlu0 %672 }
 0x33f   : > { %v724_v24 = vmul.f32 %v677_v21, %v644_v57  ;;  %v723_v38 = vmul.f32 %v673_v23, %v643_v53  ;;  %v650_v23 = vld [vmem:[#allocation2 + $0xd8] sm:$0xff] }
 0x341   : > { %v2785_v63 = vadd.f32 %v724_v24, %v2695_v62  ;;  %v2788_v41 = vadd.f32 %v723_v38, %v2698_v59  ;;  %v649_v24 = vld [vmem:[#allocation2 + $0xd0] sm:$0xff] }
 0x342   : > { %v685_v56 = vpop.permute.xlu1 %684  ;;  %v681_v36 = vpop.permute.xlu0 %680 }
 0x343   : > { %v726_v29 = vmul.f32 %v685_v56, %v646_v60  ;;  %v725_v52 = vmul.f32 %v681_v36, %v645_v32  ;;  %v652_v36 = vld [vmem:[#allocation2 + $0xe8] sm:$0xff] }
 0x345   : > { %v2791_v31 = vadd.f32 %v726_v29, %v2701_v19  ;;  %v2794_v27 = vadd.f32 %v725_v52, %v2704_v35  ;;  %v651_v29 = vld [vmem:[#allocation2 + $0xe0] sm:$0xff] }
 0x346   : > { %v693_v57 = vpop.permute.xlu1 %692  ;;  %v689_v53 = vpop.permute.xlu0 %688 }
 0x347   : > { %v728_v21 = vmul.f32 %v693_v57, %v648_v55  ;;  %v727_v62 = vmul.f32 %v689_v53, %v647_v22  ;;  %v654_v53 = vld [vmem:[#allocation2 + $0xf8] sm:$0xff] }
 0x349   : > { %v2797_v59 = vadd.f32 %v728_v21, %v2707_v37  ;;  %v2800_v38 = vadd.f32 %v727_v62, %v2710_v61  ;;  %v653_v21 = vld [vmem:[#allocation2 + $0xf0] sm:$0xff] }
 0x34a   : > { %v701_v60 = vpop.permute.xlu1 %700  ;;  %v697_v32 = vpop.permute.xlu0 %696 }
 0x34b   : > { %v730_v56 = vmul.f32 %v701_v60, %v650_v23  ;;  %v729_v19 = vmul.f32 %v697_v32, %v649_v24 }
 0x34d   : > { %v2803_v35 = vadd.f32 %v730_v56, %v2713_v33  ;;  %v2806_v52 = vadd.f32 %v729_v19, %v2716_v18 }
 0x34e   : > { %v709_v55 = vpop.permute.xlu1 %708  ;;  %v705_v22 = vpop.permute.xlu0 %704 }
 0x34f   : > { %v732_v57 = vmul.f32 %v709_v55, %v652_v36  ;;  %v731_v37 = vmul.f32 %v705_v22, %v651_v29  ;;  %1500 = sbr.rel (%p3137_p8) target bundleno = 897 (0x381), region = 288 }
 0x351   : > { %v2809_v61 = vadd.f32 %v732_v57, %v2719_v30  ;;  %v2812_v62 = vadd.f32 %v731_v37, %v2722_v34 }
 0x352   : > { %v717_v23 = vpop.permute.xlu1 %716  ;;  %v713_v24 = vpop.permute.xlu0 %712 }
 0x353   : > { %v734_v60 = vmul.f32 %v717_v23, %v654_v53  ;;  %v733_v33 = vmul.f32 %v713_v24, %v653_v21 }
 0x355   : > { %v2815_v32 = vadd.f32 %v734_v60, %v2725_v58  ;;  %v2818_v18 = vadd.f32 %v733_v33, %v2728_v28 }
 0x356 LB: >> { %s757_s23 = sadd.s32 %s2213_s29, %s2324_s13  ;;  %s1443_s0 = scalar_lea.vmem [#allocation2], %s2213_s29  ;;  %s2213_s29 = sphi %s2822_s29, %s754_s29  }
 0x357   : >> { %s758_s28 = smul.u32 6, %s757_s23  ;;  %s1444_s7 = scalar_lea.vmem %s1443_s0, 128 [#allocation2] }
 0x358   : >> { %s773_s9 = sshll.u32 %s1444_s7, 4  ;;  %s2027_s16 = scalar_lea.hbm %s3078_s1, 8192  ;;  %s774_s9 = int_to_ptr.vmem [resolvable:$true] %s773_s9 }
 0x359   : >> { %s759_s30 = sadd.s32 5, %s758_s28 }
 0x35a   : >> { %s760_s10 = sld [smem:[#allocation5 + %s759_s30]] }
 0x360   : >> { %s1557_s2 = sshll.u32 %s760_s10, 4 }
 0x361   : >> { %s762_s6 = scalar_lea.hbm %s3078_s1, %s1557_s2 }
 0x362   : >> { %s2025_s11 = scalar_lea.hbm %s762_s6, 16  ;;  %p2028_p9 = scmp.lt.u32.totalorder %s762_s6, %s3078_s1 }
 0x363   : >> { %p2026_p12 = scmp.ne.s32.totalorder %s762_s6, %s2025_s11  ;;  %p2029_p13 = scmp.lt.u32.totalorder %s2027_s16, %s2025_s11 }
 0x364   : >> { %p2031_p2 = scmp.lt.u32.totalorder %s2025_s11, %s762_s6 }
 0x365   : >> { %p2030_p0 = por %p2029_p13, %p2028_p9 }
 0x367   : >> { %p2032_p1 = por %p2031_p2, %p2030_p0 }
 0x369   : >> { %p2033_p5 = pnand %p2032_p1, %p2026_p12 }
 0x36b   : >> { %2036 = shalt.err (!%p2033_p5)  }
 0x36c   : >> { %s2037_s23 = scalar_lea.vmem %s774_s9, 16  ;;  %s2232_s28 = smov [#allocation2]  }
 0x36d   : >> { %p2038_p3 = scmp.ne.s32.totalorder %s774_s9, %s2037_s23  ;;  %s2039_s30 = sshll.u32 %s2232_s28, 4  ;;  %s2040_s30 = int_to_ptr.vmem [resolvable:$false] %s2039_s30 }
 0x36e   : >> { %s2041_s0 = scalar_lea.vmem %s2040_s30, 4096  ;;  %p2042_p4 = scmp.lt.s32.totalorder %s774_s9, %s2040_s30 }
 0x36f   : >> { %p2043_p6 = scmp.lt.s32.totalorder %s2041_s0, %s2037_s23 }
 0x371   : >> { %p2044_p7 = por %p2043_p6, %p2042_p4 }
 0x373   : >> { %p2045_p8 = pnand %p2044_p7, %p2038_p3 }
 0x375   : >> { %2048 = shalt.err (!%p2045_p8)  }
 0x376   : >> { %776 = dma.hbm_to_vmem [thread:$0]  %s762_s6, 16, %s774_s9, [#allocation3 + $0x1] }
 0x377   : >> { %s754_s29 = sadd.s32 1, %s2213_s29  }
 0x378   : >> { %p753_p9 = scmp.ge.s32.totalorder %s754_s29, %s2336_s19 }
 0x37a   : > { %756 = sbr.rel (!%p753_p9) target bundleno = 854 (0x356), region = 294 }
 0x381 PF: > { %p3138_p12 = scmp.le.s32.totalorder %s2327_s14, 0 }
 0x382   : > { %s2215_s7 = smov (!%p3138_p12), 0  }
 0x383   : > { %1505 = sbr.rel (%p3138_p12) target bundleno = 917 (0x395), region = 299 }
 0x38a LB: >> { %2151 = dma.done.wait [#allocation3], 16  ;;  %s2217_s7 = sphi %s2215_s7, %s780_s7  }
 0x38b   : >> { %2152 = vsyncadd [#allocation3], 4294967280  ;;  %s780_s7 = sadd.s32 1, %s2217_s7  }
 0x38c   : >> { %p779_p13 = scmp.ge.s32.totalorder %s780_s7, %s2336_s19 }
 0x38e   : > { %782 = sbr.rel (!%p779_p13) target bundleno = 906 (0x38a), region = 305 }
 0x395 PF: > { %v2233_v30 = vmov 3   ;;  %p3139_p0 = scmp.le.s32.totalorder %s2327_s14, 0 }
 0x396   : > { %1882 = vset.pattern.permute.xlu1 %v2233_v30  ;;  %1881 = vset.pattern.permute.xlu0 %v2233_v30  ;;  %v787_v34 = vld [vmem:[#allocation2 + $0x10] sm:$0xff]  ;;  %v785_v58 = vld [vmem:[#allocation2] sm:$0xff]  ;;  %v788_v29 = vld [vmem:[#allocation2 + $0x18] sm:$0xff]  ;;  %s2219_s13 = smov (!%p3139_p0), 0  }
 0x397   : > { %810 = vperm.xlu1 %1882, %v2371_v2   ;;  %802 = vperm.xlu0 %1881, %v2365_v0   ;;  %v786_v55 = vld [vmem:[#allocation2 + $0x8] sm:$0xff]  ;;  %v789_v60 = vld [vmem:[#allocation2 + $0x20] sm:$0xff] }
 0x398   : > { %v790_v24 = vld [vmem:[#allocation2 + $0x28] sm:$0xff] }
 0x39b   : > { %814 = vperm.xlu1 %1882, %v2374_v3   ;;  %806 = vperm.xlu0 %1881, %v2368_v1  }
 0x39f   : > { %822 = vperm.xlu1 %1882, %v2380_v5   ;;  %818 = vperm.xlu0 %1881, %v2377_v4  }
 0x3a3   : > { %830 = vperm.xlu1 %1882, %v2386_v7   ;;  %826 = vperm.xlu0 %1881, %v2383_v6  }
 0x3a7   : > { %838 = vperm.xlu1 %1882, %v2392_v9   ;;  %834 = vperm.xlu0 %1881, %v2389_v8  }
 0x3ab   : > { %846 = vperm.xlu1 %1882, %v2398_v11   ;;  %842 = vperm.xlu0 %1881, %v2395_v10  }
 0x3af   : > { %854 = vperm.xlu1 %1882, %v2404_v13   ;;  %850 = vperm.xlu0 %1881, %v2401_v12  }
 0x3b3   : > { %862 = vperm.xlu1 %1882, %v2410_v15   ;;  %858 = vperm.xlu0 %1881, %v2407_v14  }
 0x416   : > { %v811_v28 = vpop.permute.xlu1 %810  ;;  %v803_v56 = vpop.permute.xlu0 %802 }
 0x417   : > { %v867_v19 = vmul.f32 %v811_v28, %v787_v34  ;;  %v865_v36 = vmul.f32 %v803_v56, %v785_v58  ;;  %v792_v56 = vld [vmem:[#allocation2 + $0x38] sm:$0xff] }
 0x419   : > { %v2863_v22 = vadd.f32 %v867_v19, %v2773_v26  ;;  %v2866_v57 = vadd.f32 %v865_v36, %v2776_v54  ;;  %v791_v19 = vld [vmem:[#allocation2 + $0x30] sm:$0xff] }
 0x41a   : > { %v815_v37 = vpop.permute.xlu1 %814  ;;  %v807_v53 = vpop.permute.xlu0 %806 }
 0x41b   : > { %v868_v21 = vmul.f32 %v815_v37, %v788_v29  ;;  %v866_v23 = vmul.f32 %v807_v53, %v786_v55  ;;  %v794_v53 = vld [vmem:[#allocation2 + $0x48] sm:$0xff] }
 0x41d   : > { %v2869_v33 = vadd.f32 %v868_v21, %v2779_v25  ;;  %v2872_v30 = vadd.f32 %v866_v23, %v2782_v20  ;;  %v793_v21 = vld [vmem:[#allocation2 + $0x40] sm:$0xff] }
 0x41e   : > { %v823_v34 = vpop.permute.xlu1 %822  ;;  %v819_v58 = vpop.permute.xlu0 %818 }
 0x41f   : > { %v870_v28 = vmul.f32 %v823_v34, %v790_v24  ;;  %v869_v26 = vmul.f32 %v819_v58, %v789_v60  ;;  %v796_v58 = vld [vmem:[#allocation2 + $0x58] sm:$0xff] }
 0x421   : > { %v2875_v54 = vadd.f32 %v870_v28, %v2785_v63  ;;  %v2878_v36 = vadd.f32 %v869_v26, %v2788_v41  ;;  %v795_v28 = vld [vmem:[#allocation2 + $0x50] sm:$0xff] }
 0x422   : > { %v831_v29 = vpop.permute.xlu1 %830  ;;  %v827_v55 = vpop.permute.xlu0 %826 }
 0x423   : > { %v872_v37 = vmul.f32 %v831_v29, %v792_v56  ;;  %v871_v25 = vmul.f32 %v827_v55, %v791_v19  ;;  %v798_v55 = vld [vmem:[#allocation2 + $0x68] sm:$0xff] }
 0x425   : > { %v2881_v20 = vadd.f32 %v872_v37, %v2791_v31  ;;  %v2884_v23 = vadd.f32 %v871_v25, %v2794_v27  ;;  %v797_v37 = vld [vmem:[#allocation2 + $0x60] sm:$0xff] }
 0x426   : > { %v839_v24 = vpop.permute.xlu1 %838  ;;  %v835_v60 = vpop.permute.xlu0 %834 }
 0x427   : > { %v874_v34 = vmul.f32 %v839_v24, %v794_v53  ;;  %v873_v63 = vmul.f32 %v835_v60, %v793_v21  ;;  %v800_v60 = vld [vmem:[#allocation2 + $0x78] sm:$0xff] }
 0x429   : > { %v2887_v41 = vadd.f32 %v874_v34, %v2797_v59  ;;  %v2890_v26 = vadd.f32 %v873_v63, %v2800_v38  ;;  %v799_v34 = vld [vmem:[#allocation2 + $0x70] sm:$0xff] }
 0x42a   : > { %v847_v56 = vpop.permute.xlu1 %846  ;;  %v843_v19 = vpop.permute.xlu0 %842 }
 0x42b   : > { %v876_v29 = vmul.f32 %v847_v56, %v796_v58  ;;  %v875_v31 = vmul.f32 %v843_v19, %v795_v28 }
 0x42d   : > { %v2893_v27 = vadd.f32 %v876_v29, %v2803_v35  ;;  %v2896_v25 = vadd.f32 %v875_v31, %v2806_v52 }
 0x42e   : > { %v855_v53 = vpop.permute.xlu1 %854  ;;  %v851_v21 = vpop.permute.xlu0 %850 }
 0x42f   : > { %v878_v24 = vmul.f32 %v855_v53, %v798_v55  ;;  %v877_v59 = vmul.f32 %v851_v21, %v797_v37  ;;  %1510 = sbr.rel (%p3139_p0) target bundleno = 1089 (0x441), region = 310 }
 0x431   : > { %v2899_v38 = vadd.f32 %v878_v24, %v2809_v61  ;;  %v2902_v63 = vadd.f32 %v877_v59, %v2812_v62 }
 0x432   : > { %v863_v58 = vpop.permute.xlu1 %862  ;;  %v859_v28 = vpop.permute.xlu0 %858 }
 0x433   : > { %v880_v56 = vmul.f32 %v863_v58, %v800_v60  ;;  %v879_v35 = vmul.f32 %v859_v28, %v799_v34 }
 0x435   : > { %v2905_v19 = vadd.f32 %v880_v56, %v2815_v32  ;;  %v2908_v52 = vadd.f32 %v879_v35, %v2818_v18 }
 0x436 LB: >> { %2153 = dma.done.wait [#allocation3 + $0x1], 16  ;;  %s2221_s13 = sphi %s2219_s13, %s900_s13  }
 0x437   : >> { %2154 = vsyncadd [#allocation3 + $0x1], 4294967280  ;;  %s900_s13 = sadd.s32 1, %s2221_s13  }
 0x438   : >> { %p899_p2 = scmp.ge.s32.totalorder %s900_s13, %s2336_s19 }
 0x43a   : > { %902 = sbr.rel (!%p899_p2) target bundleno = 1078 (0x436), region = 316 }
 0x441 PF: > { %v1568_v61 = vcombine.low %v2487_v39, %v2492_v40  ;;  %v3140_v32 = vpack.c.bf16 %v2440_v17, %v2438_v16  ;;  %v2234_v18 = vmov 4   ;;  %v1569_v29 = vcombine.low %v2499_v42, %v2504_v43  ;;  %s1619_s28 = sshll.u32 %s2292_s27, 11  ;;  %s1378_s30 = sshll.u32 %s2338_s20, 4  ;;  %s3029_s30 = int_to_ptr.vmem [resolvable:$true] %s1378_s30 }
 0x442   : > { %v1885_v62 = vld [vmem:[%s3081_s4] sm:$0xff]   ;;  %1884 = vset.pattern.permute.xlu1 %v2234_v18  ;;  %1883 = vset.pattern.permute.xlu0 %v2234_v18  ;;  %v1886_v31 = vld [vmem:[%s3081_s4 + $0x8] sm:$0xff]   ;;  %v1570_v16 = vcombine.low %v2509_v44, %v2514_v45  ;;  %v1887_v17 = vld [vmem:[%s3081_s4 + $0x10] sm:$0xff]   ;;  %s3027_s13 = scalar_lea.hbm %s3082_s5, %s1619_s28  ;;  %s3166_s27 = sand.u32 1, %s2165_s25  }
 0x443   : > { %1700 = vmatprep.mubr.bf16.mxu0 %v3140_v32  ;;  %931 = vperm.xlu1 %1884, %v2371_v2   ;;  %v1888_v2 = vld [vmem:[%s3081_s4 + $0x18] sm:$0xff]   ;;  %v1891_v40 = vld [vmem:[%s3081_s4 + $0x30] sm:$0xff]   ;;  %v3163_v24 = vld [vmem:[#allocation47_spill] sm:$0xff]  ;;  %s3036_s29 = scalar_lea.sflag [#allocation7], %s3166_s27  ;;  %s2049_s10 = scalar_lea.vmem %s3029_s30, 2048 }
 0x444   : > { %923 = vperm.xlu0 %1883, %v2365_v0   ;;  %1684 = vmatprep.subr.bf16.mxu0 %v1568_v61  ;;  %v1571_v0 = vcombine.low %v2519_v46, %v2524_v47  ;;  %v1892_v43 = vld [vmem:[%s3081_s4 + $0x38] sm:$0xff]   ;;  %v3149_v46 = vld [vmem:[#allocation36_spill] sm:$0xff]  ;;  %v3164_v59 = vld [vmem:[#allocation46_spill] sm:$0xff]  ;;  %p2050_p1 = scmp.ne.s32.totalorder %s3029_s30, %s2049_s10  ;;  %s2235_s14 = smov [#allocation6]  }
 0x445   : > { %1652 = vmatprep.subr.bf16.mxu1 %v1885_v62  ;;  %1685 = vmatpush3.bf16.msra.mxu0 %v1568_v61  ;;  %v3148_v45 = vld [vmem:[#allocation37_spill] sm:$0xff]  ;;  %v3161_v53 = vld [vmem:[#allocation44_spill] sm:$0xff]  ;;  %v3165_v60 = vpack.c.bf16 %v3163_v24, %v3164_v59  ;;  %v906_v56 = vld [vmem:[#allocation2 + $0x80] sm:$0xff]  ;;  %s2053_s9 = sshll.u32 %s2235_s14, 4  ;;  %s2054_s9 = int_to_ptr.vmem [resolvable:$false] %s2053_s9 }
 0x446   : > { %1653 = vmatpush3.bf16.msra.mxu1 %v1885_v62  ;;  %1686 = vmatprep.subr.bf16.mxu0 %v1569_v29  ;;  %v3150_v47 = vpack.c.bf16 %v3148_v45, %v3149_v46  ;;  %v3160_v37 = vld [vmem:[#allocation45_spill] sm:$0xff]  ;;  %v908_v58 = vld [vmem:[#allocation2 + $0x90] sm:$0xff]  ;;  %v907_v61 = vld [vmem:[#allocation2 + $0x88] sm:$0xff]  ;;  %p2051_p5 = pnand %p2050_p1, %p2309_p10  ;;  %s2055_s19 = scalar_lea.vmem %s2054_s9, 4096 }
 0x447   : > { %1654 = vmatprep.subr.bf16.mxu1 %v1886_v31  ;;  %935 = vperm.xlu1 %1884, %v2374_v3   ;;  %v1889_v3 = vld [vmem:[%s3081_s4 + $0x20] sm:$0xff]   ;;  %v3162_v21 = vpack.c.bf16 %v3160_v37, %v3161_v53  ;;  %v909_v35 = vld [vmem:[#allocation2 + $0x98] sm:$0xff]  ;;  %p2056_p4 = scmp.lt.s32.totalorder %s3029_s30, %s2054_s9  ;;  %p2057_p6 = scmp.lt.s32.totalorder %s2055_s19, %s2049_s10 }
 0x448   : > { %927 = vperm.xlu0 %1883, %v2368_v1   ;;  %v1572_v1 = vcombine.low %v2529_v48, %v2534_v49  ;;  %v3154_v49 = vld [vmem:[#allocation41_spill] sm:$0xff]  ;;  %v914_v45 = vld [vmem:[#allocation2 + $0xc0] sm:$0xff]  ;;  %p2052_p3 = pneg %p2051_p5 }
 0x449   : > { %1687 = vmatpush3.bf16.msra.mxu0 %v1569_v29  ;;  %p2058_p7 = por %p2057_p6, %p2056_p4 }
 0x44a   : > { %1655 = vmatpush3.bf16.msra.mxu1 %v1886_v31  ;;  %1688 = vmatprep.subr.bf16.mxu0 %v1570_v16 }
 0x44b   : > { %1656 = vmatprep.subr.bf16.mxu1 %v1887_v17  ;;  %943 = vperm.xlu1 %1884, %v2380_v5   ;;  %v1890_v5 = vld [vmem:[%s3081_s4 + $0x28] sm:$0xff]   ;;  %p2059_p8 = pnand %p2058_p7, %p2052_p3 }
 0x44c   : > { %939 = vperm.xlu0 %1883, %v2377_v4   ;;  %v1573_v4 = vcombine.low %v2539_v50, %v2544_v51  ;;  %v3155_v50 = vld [vmem:[#allocation40_spill] sm:$0xff] }
 0x44d   : > { %1689 = vmatpush3.bf16.msra.mxu0 %v1570_v16  ;;  %v3156_v51 = vpack.c.bf16 %v3154_v49, %v3155_v50  ;;  %v916_v50 = vld [vmem:[#allocation2 + $0xd0] sm:$0xff] }
 0x44e   : > { %1657 = vmatpush3.bf16.msra.mxu1 %v1887_v17  ;;  %1690 = vmatprep.subr.bf16.mxu0 %v1571_v0  ;;  %v911_v17 = vld [vmem:[#allocation2 + $0xa8] sm:$0xff] }
 0x44f   : > { %1658 = vmatprep.subr.bf16.mxu1 %v1888_v2  ;;  %951 = vperm.xlu1 %1884, %v2386_v7   ;;  %v3142_v7 = vld [vmem:[#allocation48_spill] sm:$0xff] }
 0x450   : > { %947 = vperm.xlu0 %1883, %v2383_v6   ;;  %v3141_v6 = vld [vmem:[#allocation49_spill] sm:$0xff] }
 0x451   : > { %1691 = vmatpush3.bf16.msra.mxu0 %v1571_v0  ;;  %v1574_v39 = vcombine.low %v3142_v7, %v3141_v6  ;;  %v910_v0 = vld [vmem:[#allocation2 + $0xa0] sm:$0xff] }
 0x452   : > { %1659 = vmatpush3.bf16.msra.mxu1 %v1888_v2  ;;  %1692 = vmatprep.subr.bf16.mxu0 %v1572_v1 }
 0x453   : > { %1660 = vmatprep.subr.bf16.mxu1 %v1889_v3  ;;  %959 = vperm.xlu1 %1884, %v2392_v9   ;;  %v3144_v9 = vld [vmem:[#allocation50_spill] sm:$0xff] }
 0x454   : > { %955 = vperm.xlu0 %1883, %v2389_v8   ;;  %v3143_v8 = vld [vmem:[#allocation51_spill] sm:$0xff] }
 0x455   : > { %1693 = vmatpush3.bf16.msra.mxu0 %v1572_v1  ;;  %v1575_v42 = vcombine.low %v3144_v9, %v3143_v8  ;;  %v913_v9 = vld [vmem:[#allocation2 + $0xb8] sm:$0xff] }
 0x456   : > { %1661 = vmatpush3.bf16.msra.mxu1 %v1889_v3  ;;  %1694 = vmatprep.subr.bf16.mxu0 %v1573_v4 }
 0x457   : > { %1662 = vmatprep.subr.bf16.mxu1 %v1890_v5  ;;  %967 = vperm.xlu1 %1884, %v2398_v11   ;;  %v3146_v11 = vld [vmem:[#allocation34_spill] sm:$0xff] }
 0x458   : > { %963 = vperm.xlu0 %1883, %v2395_v10   ;;  %v3145_v10 = vld [vmem:[#allocation35_spill] sm:$0xff] }
 0x459   : > { %1695 = vmatpush3.bf16.msra.mxu0 %v1573_v4  ;;  %v3147_v44 = vpack.c.bf16 %v3145_v10, %v3146_v11 }
 0x45a   : > { %1663 = vmatpush3.bf16.msra.mxu1 %v1890_v5  ;;  %1696 = vmatprep.subr.bf16.mxu0 %v1574_v39 }
 0x45b   : > { %1664 = vmatprep.subr.bf16.mxu1 %v1891_v40  ;;  %975 = vperm.xlu1 %1884, %v2404_v13   ;;  %v3151_v13 = vld [vmem:[#allocation39_spill] sm:$0xff] }
 0x45c   : > { %971 = vperm.xlu0 %1883, %v2401_v12   ;;  %v3152_v12 = vld [vmem:[#allocation38_spill] sm:$0xff] }
 0x45d   : > { %1697 = vmatpush3.bf16.msra.mxu0 %v1574_v39  ;;  %v3153_v48 = vpack.c.bf16 %v3151_v13, %v3152_v12 }
 0x45e   : > { %1665 = vmatpush3.bf16.msra.mxu1 %v1891_v40  ;;  %1698 = vmatprep.subr.bf16.mxu0 %v1575_v42 }
 0x45f   : > { %1666 = vmatprep.subr.bf16.mxu1 %v1892_v43  ;;  %983 = vperm.xlu1 %1884, %v2410_v15   ;;  %v3157_v15 = vld [vmem:[#allocation43_spill] sm:$0xff] }
 0x460   : > { %979 = vperm.xlu0 %1883, %v2407_v14   ;;  %v3158_v14 = vld [vmem:[#allocation42_spill] sm:$0xff] }
 0x461   : > { %1699 = vmatpush3.bf16.msra.mxu0 %v1575_v42  ;;  %v3159_v55 = vpack.c.bf16 %v3157_v15, %v3158_v14  ;;  %v912_v42 = vld [vmem:[#allocation2 + $0xb0] sm:$0xff] }
 0x462   : > { %1667 = vmatpush3.bf16.msra.mxu1 %v1892_v43 }
 0x464   : > { %1701 = vmatmul.mubr.bf16.vlgmr.msra.gmra.mrb[0].mxu0 %v3147_v44 }
 0x465   : > { %1704 = vmatprep.mubr.bf16.mxu0 %v3150_v47 }
 0x46c   : > { %1705 = vmatmul.mubr.bf16.gmra.mrb[4].mxu0 %v3153_v48 }
 0x46d   : > { %1708 = vmatprep.mubr.bf16.mxu0 %v3156_v51 }
 0x474   : > { %1709 = vmatmul.mubr.bf16.gmra.mrb[8].mxu0 %v3159_v55 }
 0x475   : > { %1712 = vmatprep.mubr.bf16.mxu0 %v3162_v21  ;;  %v919_v21 = vld [vmem:[#allocation2 + $0xe8] sm:$0xff] }
 0x47c   : > { %1713 = vmatmul.mubr.bf16.gmra.mrb[12].mxu0 %v3165_v60 }
 0x4c2   : > { %v932_v34 = vpop.permute.xlu1 %931 }
 0x4c3   : > { %v924_v28 = vpop.permute.xlu0 %923  ;;  %v988_v62 = vmul.f32 %v932_v34, %v908_v58 }
 0x4c4   : > { %v986_v32 = vmul.f32 %v924_v28, %v906_v56  ;;  %v921_v56 = vld [vmem:[#allocation2 + $0xf8] sm:$0xff] }
 0x4c5   : > { %v1004_v2 = vadd.f32 %v988_v62, %v2863_v22 }
 0x4c6   : > { %v936_v18 = vpop.permute.xlu1 %935  ;;  %v1002_v1 = vadd.f32 %v986_v32, %v2866_v57 }
 0x4c7   : > { %v928_v29 = vpop.permute.xlu0 %927  ;;  %v989_v31 = vmul.f32 %v936_v18, %v909_v35 }
 0x4c8   : > { %v987_v16 = vmul.f32 %v928_v29, %v907_v61 }
 0x4c9   : > { %v1005_v3 = vadd.f32 %v989_v31, %v2869_v33 }
 0x4ca   : > { %v1003_v4 = vadd.f32 %v987_v16, %v2872_v30  ;;  %v944_v5 = vpop.permute.xlu1 %943  ;;  %v915_v30 = vld [vmem:[#allocation2 + $0xc8] sm:$0xff] }
 0x4cb   : > { %v940_v6 = vpop.permute.xlu0 %939  ;;  %v1019_v7 = vpack.c.bf16 %v1005_v3, %v1004_v2  ;;  %v991_v39 = vmul.f32 %v944_v5, %v911_v17 }
 0x4cc   : > { %v990_v40 = vmul.f32 %v940_v6, %v910_v0  ;;  %v1018_v8 = vpack.c.bf16 %v1003_v4, %v1002_v1 }
 0x4cd   : > { %v1007_v43 = vadd.f32 %v991_v39, %v2875_v54 }
 0x4ce   : > { %v1006_v10 = vadd.f32 %v990_v40, %v2878_v36  ;;  %1668 = vmatprep.mubr.bf16.mxu1 %v1018_v8  ;;  %v952_v22 = vpop.permute.xlu1 %951  ;;  %v917_v36 = vld [vmem:[#allocation2 + $0xd8] sm:$0xff] }
 0x4cf   : > { %v948_v11 = vpop.permute.xlu0 %947  ;;  %1669 = vmatmul.mubr.bf16.vlgmr.msra.gmra.mrb[0].mxu1 %v1019_v7  ;;  %v993_v33 = vmul.f32 %v952_v22, %v913_v9 }
 0x4d0   : > { %v1020_v57 = vpack.c.bf16 %v1007_v43, %v1006_v10  ;;  %v992_v44 = vmul.f32 %v948_v11, %v912_v42 }
 0x4d1   : > { %v1009_v46 = vadd.f32 %v993_v33, %v2881_v20 }
 0x4d2   : > { %v1008_v47 = vadd.f32 %v992_v44, %v2884_v23  ;;  %1672 = vmatprep.mubr.bf16.mxu1 %v1020_v57  ;;  %v960_v13 = vpop.permute.xlu1 %959  ;;  %v918_v23 = vld [vmem:[#allocation2 + $0xe0] sm:$0xff] }
 0x4d3   : > { %v956_v12 = vpop.permute.xlu0 %955  ;;  %v995_v54 = vmul.f32 %v960_v13, %v915_v30 }
 0x4d4   : > { %v1021_v48 = vpack.c.bf16 %v1009_v46, %v1008_v47  ;;  %v994_v49 = vmul.f32 %v956_v12, %v914_v45 }
 0x4d5   : > { %v1011_v51 = vadd.f32 %v995_v54, %v2887_v41 }
 0x4d6   : > { %v1010_v15 = vadd.f32 %v994_v49, %v2890_v26  ;;  %v968_v14 = vpop.permute.xlu1 %967  ;;  %v920_v26 = vld [vmem:[#allocation2 + $0xf0] sm:$0xff] }
 0x4d7   : > { %v964_v55 = vpop.permute.xlu0 %963  ;;  %1673 = vmatmul.mubr.bf16.gmra.mrb[4].mxu1 %v1021_v48  ;;  %v997_v53 = vmul.f32 %v968_v14, %v917_v36 }
 0x4d8   : > { %v1022_v37 = vpack.c.bf16 %v1011_v51, %v1010_v15  ;;  %v996_v20 = vmul.f32 %v964_v55, %v916_v50 }
 0x4d9   : > { %v1013_v24 = vadd.f32 %v997_v53, %v2893_v27 }
 0x4da   : > { %v1012_v59 = vadd.f32 %v996_v20, %v2896_v25  ;;  %1676 = vmatprep.mubr.bf16.mxu1 %v1022_v37  ;;  %v976_v60 = vpop.permute.xlu1 %975 }
 0x4db   : > { %v972_v34 = vpop.permute.xlu0 %971  ;;  %v999_v28 = vmul.f32 %v976_v60, %v919_v21 }
 0x4dc   : > { %v1023_v58 = vpack.c.bf16 %v1013_v24, %v1012_v59  ;;  %v998_v41 = vmul.f32 %v972_v34, %v918_v23 }
 0x4dd   : > { %v1015_v35 = vadd.f32 %v999_v28, %v2899_v38 }
 0x4de   : > { %v1014_v61 = vadd.f32 %v998_v41, %v2902_v63  ;;  %v984_v62 = vpop.permute.xlu1 %983 }
 0x4df   : > { %v980_v32 = vpop.permute.xlu0 %979  ;;  %1677 = vmatmul.mubr.bf16.gmra.mrb[8].mxu1 %v1023_v58  ;;  %v1001_v29 = vmul.f32 %v984_v62, %v921_v56 }
 0x4e0   : > { %v1024_v18 = vpack.c.bf16 %v1015_v35, %v1014_v61  ;;  %v1000_v27 = vmul.f32 %v980_v32, %v920_v26 }
 0x4e1   : > { %v1017_v25 = vadd.f32 %v1001_v29, %v2905_v19 }
 0x4e2   : > { %v1016_v31 = vadd.f32 %v1000_v27, %v2908_v52  ;;  %1680 = vmatprep.mubr.bf16.mxu1 %v1024_v18 }
 0x4e4   : > { %v1025_v16 = vpack.c.bf16 %v1017_v25, %v1016_v31 }
 0x4e7   : > { %1681 = vmatmul.mubr.bf16.gmra.mrb[12].mxu1 %v1025_v16 }
 0x537   : > { %v1702_v17 = vpop.f32.mrb[0].mxu0 }
 0x538   : > { %v1269_v0 = vpop.f32.mrb[1].mxu0 }
 0x539   : > { %v1703_v2 = vpop.f32.mrb[2].mxu0 }
 0x53a   : > { %v1272_v1 = vpop.f32.mrb[3].mxu0 }
 0x53f   : > { %v1706_v38 = vpop.f32.mrb[4].mxu0 }
 0x540   : > { %v1285_v3 = vpop.f32.mrb[5].mxu0 }
 0x541   : > { %v1707_v63 = vpop.f32.mrb[6].mxu0 }
 0x542   : > { %v1288_v4 = vpop.f32.mrb[7].mxu0 }
 0x547   : > { %v1710_v5 = vpop.f32.mrb[8].mxu0 }
 0x548   : > { %v1301_v6 = vpop.f32.mrb[9].mxu0 }
 0x549   : > { %v1711_v7 = vpop.f32.mrb[10].mxu0 }
 0x54a   : > { %v1304_v39 = vpop.f32.mrb[11].mxu0 }
 0x54f   : > { %v1714_v40 = vpop.f32.mrb[12].mxu0 }
 0x550   : > { %v1317_v19 = vpop.f32.mrb[13].mxu0 }
 0x551   : > { %v1715_v52 = vpop.f32.mrb[14].mxu0 }
 0x552   : > { %v1320_v8 = vpop.f32.mrb[15].mxu0 }
 0x5a2   : > { %v1670_v9 = vpop.f32.mrb[0].mxu1 }
 0x5a3   : > { %v1278_v42 = vadd.f32 %v1702_v17, %v1670_v9  ;;  %v1124_v43 = vpop.f32.mrb[1].mxu1 }
 0x5a4   : > { %v1270_v10 = vadd.f32 %v1269_v0, %v1124_v43  ;;  %v1671_v22 = vpop.f32.mrb[2].mxu1 }
 0x5a5   : > { %v1334_v11 = vmax.f32 %v1278_v42, 0.0  ;;  %v1281_v57 = vadd.f32 %v1703_v2, %v1671_v22  ;;  %v1127_v33 = vpop.f32.mrb[3].mxu1 }
 0x5a6   : > { %v1332_v44 = vmax.f32 %v1270_v10, 0.0  ;;  %v1273_v30 = vadd.f32 %v1272_v1, %v1127_v33 }
 0x5a7   : > { %1350 = vst [vmem:[%s2338_s20 + $0x10] sm:$0xff] %v1334_v11  ;;  %v1335_v45 = vmax.f32 %v1281_v57, 0.0 }
 0x5a8   : > { %1348 = vst [vmem:[%s2338_s20] sm:$0xff] %v1332_v44  ;;  %v1333_v46 = vmax.f32 %v1273_v30, 0.0 }
 0x5a9   : > { %1351 = vst [vmem:[%s2338_s20 + $0x18] sm:$0xff] %v1335_v45 }
 0x5aa   : > { %1349 = vst [vmem:[%s2338_s20 + $0x8] sm:$0xff] %v1333_v46  ;;  %v1674_v47 = vpop.f32.mrb[4].mxu1 }
 0x5ab   : > { %v1294_v13 = vadd.f32 %v1706_v38, %v1674_v47  ;;  %v1140_v12 = vpop.f32.mrb[5].mxu1 }
 0x5ac   : > { %v1286_v48 = vadd.f32 %v1285_v3, %v1140_v12  ;;  %v1675_v54 = vpop.f32.mrb[6].mxu1 }
 0x5ad   : > { %v1338_v49 = vmax.f32 %v1294_v13, 0.0  ;;  %v1297_v36 = vadd.f32 %v1707_v63, %v1675_v54  ;;  %v1143_v50 = vpop.f32.mrb[7].mxu1 }
 0x5ae   : > { %v1336_v51 = vmax.f32 %v1286_v48, 0.0  ;;  %v1289_v15 = vadd.f32 %v1288_v4, %v1143_v50 }
 0x5af   : > { %1354 = vst [vmem:[%s2338_s20 + $0x30] sm:$0xff] %v1338_v49  ;;  %v1339_v14 = vmax.f32 %v1297_v36, 0.0 }
 0x5b0   : > { %1352 = vst [vmem:[%s2338_s20 + $0x20] sm:$0xff] %v1336_v51  ;;  %v1337_v55 = vmax.f32 %v1289_v15, 0.0 }
 0x5b1   : > { %1355 = vst [vmem:[%s2338_s20 + $0x38] sm:$0xff] %v1339_v14 }
 0x5b2   : > { %1353 = vst [vmem:[%s2338_s20 + $0x28] sm:$0xff] %v1337_v55  ;;  %v1678_v37 = vpop.f32.mrb[8].mxu1 }
 0x5b3   : > { %v1310_v53 = vadd.f32 %v1710_v5, %v1678_v37  ;;  %v1156_v20 = vpop.f32.mrb[9].mxu1 }
 0x5b4   : > { %v1302_v21 = vadd.f32 %v1301_v6, %v1156_v20  ;;  %v1679_v23 = vpop.f32.mrb[10].mxu1 }
 0x5b5   : > { %v1342_v24 = vmax.f32 %v1310_v53, 0.0  ;;  %v1313_v59 = vadd.f32 %v1711_v7, %v1679_v23  ;;  %v1159_v60 = vpop.f32.mrb[11].mxu1 }
 0x5b6   : > { %v1340_v34 = vmax.f32 %v1302_v21, 0.0  ;;  %v1305_v58 = vadd.f32 %v1304_v39, %v1159_v60 }
 0x5b7   : > { %1358 = vst [vmem:[%s2338_s20 + $0x50] sm:$0xff] %v1342_v24  ;;  %v1343_v28 = vmax.f32 %v1313_v59, 0.0 }
 0x5b8   : > { %1356 = vst [vmem:[%s2338_s20 + $0x40] sm:$0xff] %v1340_v34  ;;  %v1341_v41 = vmax.f32 %v1305_v58, 0.0 }
 0x5b9   : > { %1359 = vst [vmem:[%s2338_s20 + $0x58] sm:$0xff] %v1343_v28 }
 0x5ba   : > { %1357 = vst [vmem:[%s2338_s20 + $0x48] sm:$0xff] %v1341_v41  ;;  %v1682_v56 = vpop.f32.mrb[12].mxu1 }
 0x5bb   : > { %v1326_v26 = vadd.f32 %v1714_v40, %v1682_v56  ;;  %v1172_v35 = vpop.f32.mrb[13].mxu1 }
 0x5bc   : > { %v1318_v61 = vadd.f32 %v1317_v19, %v1172_v35  ;;  %v1683_v62 = vpop.f32.mrb[14].mxu1 }
 0x5bd   : > { %v1346_v32 = vmax.f32 %v1326_v26, 0.0  ;;  %v1329_v18 = vadd.f32 %v1715_v52, %v1683_v62  ;;  %v1175_v29 = vpop.f32.mrb[15].mxu1 }
 0x5be   : > { %v1344_v27 = vmax.f32 %v1318_v61, 0.0  ;;  %v1321_v25 = vadd.f32 %v1320_v8, %v1175_v29 }
 0x5bf   : > { %1362 = vst [vmem:[%s2338_s20 + $0x70] sm:$0xff] %v1346_v32  ;;  %v1347_v31 = vmax.f32 %v1329_v18, 0.0 }
 0x5c0   : > { %1360 = vst [vmem:[%s2338_s20 + $0x60] sm:$0xff] %v1344_v27  ;;  %v1345_v16 = vmax.f32 %v1321_v25, 0.0 }
 0x5c1   : > { %1363 = vst [vmem:[%s2338_s20 + $0x78] sm:$0xff] %v1347_v31 }
 0x5c2   : > { %1361 = vst [vmem:[%s2338_s20 + $0x68] sm:$0xff] %v1345_v16 }
 0x5c3   : > { %2062 = shalt.err (!%p2059_p8)
}
 0x5c4   : > { %s2063_s20 = scalar_lea.hbm %s3027_s13, 2048  ;;  %s2067_s18 = scalar_lea.hbm %s3082_s5, 4096 }
 0x5c5   : > { %p2064_p9 = scmp.ne.s32.totalorder %s3027_s13, %s2063_s20  ;;  %p2068_p0 = scmp.lt.u32.totalorder %s3027_s13, %s3082_s5 }
 0x5c6   : > { %p2069_p2 = scmp.lt.u32.totalorder %s2067_s18, %s2063_s20  ;;  %p2071_p5 = scmp.lt.u32.totalorder %s2063_s20, %s3027_s13 }
 0x5c7   : > { %p2065_p12 = pnand %p2064_p9, %p2309_p10 }
 0x5c8   : > { %p2070_p1 = por %p2069_p2, %p2068_p0 }
 0x5c9   : > { %p2066_p13 = pneg %p2065_p12 }
 0x5ca   : > { %p2072_p3 = por %p2071_p5, %p2070_p1 }
 0x5cc   : > { %p2073_p4 = pnand %p2072_p3, %p2066_p13 }
 0x5ce   : > { %2076 = shalt.err (!%p2073_p4)
}
 0x5cf   : > { %s2236_s12 = smov 128   ;;  %s2237_s15 = smov 8  }
 0x5d0   : > { %1732 = dma.vmem_to_hbm [thread:$0]  (%p2309_p10), %s3029_s30, 2048, %s3027_s13, %s3036_s29, %s2236_s12, %s2236_s12, %s2237_s15  }
 0x5d1 PF: > { %p1738_p6 = scmp.ge.s32.totalorder %s2173_s26, 2  ;;  %s1393_s17 = sand.u32 1, %s2161_s24  }
 0x5d2   : > { %s1394_s22 = scalar_lea.sflag [#allocation7], %s1393_s17 }
 0x5d3   : > { %p1735_p7 = pnand %p1738_p6, %p2313_p11 }
 0x5d5   : > { %2156 = dma.done.wait (!%p1735_p7), %s1394_s22, 2048  }
 0x5d6   : > { %2158 = vsyncadd (!%p1735_p7), %s1394_s22, 4294965248  ;;  %s3168_s26 = sld [smem:[#allocation31_spill]]  ;;  %s3169_s23 = sld [smem:[#allocation30_spill]] }
 0x5d7   : > { %s3170_s0 = sld [smem:[#allocation32_spill]]  ;;  %s3171_s24 = smov %s2165_s25 }
 0x5dc   : > { %p21_p8 = scmp.ge.s32.totalorder %s3168_s26, 4   ;;  %s3172_s25 = smov %s3169_s23 }
 0x5de   :  { %23 = sbr.rel (!%p21_p8) target bundleno = 19 (0x13), region = 327 }
 0x5e5   :  { %1399 = vsyncpa [#allocation7], 1 }
 0x5e6   :  { %1401 = vsyncpa [#allocation7 + $0x1], 1 }
 0x5e7   :  { %1402 = vsyncmov [#allocation3] }
 0x5ea   :  { %s1403_s8 = vpop.sfrf %1402 }
 0x5eb   :  { %p1581_p10 = scmp.ne.s32.totalorder %s1403_s8, 0 }
 0x5ed   :  { %1407 = shalt.err (%p1581_p10)  }
 0x5ee   :  { %1409 = vsyncmov [#allocation3 + $0x1] }
 0x5f1   :  { %s1410_s28 = vpop.sfrf %1409 }
 0x5f2   :  { %p1582_p11 = scmp.ne.s32.totalorder %s1410_s28, 0 }
 0x5f4   :  { %1414 = shalt.err (%p1582_p11)  }

</bundles_post_ra>
